<compile_context>
chip_gen: v7x
topology: tpu7x:2x2x1
jax: 0.10.0
libtpu: 0.0.40
codegen_flags: <defaults>
</compile_context>

<pallas_src>
import functools
import math

import jax
import jax.numpy as jnp
from jax.experimental import pallas as pl
from jax.experimental.pallas import tpu as pltpu

LEAKY_SLOPE = 0.01      # ABN default leaky_relu activation_param
BN_EPS = 1e-5

TN_MAX = 256            # max output-channel tile (lane dim, multiple of 128)
TM_MAX = 1024           # max row tile (shrunk automatically by VMEM budget)
LHS_BLOCK_BUDGET = 5 << 19   # ~2.5 MiB cap for the (tm, K) bf16 LHS block

STRUCTURE = (1, 1, 1, 1)
BOTTLENECK = True
CLASSES = 10


def _round_up(x, m):
    return ((x + m - 1) // m) * m


def _pick_tiles(M, K, Np):
    """Adaptive (tm, tn) so the double-buffered working set fits scoped VMEM."""
    tn = min(TN_MAX, Np)                              # Np is a multiple of 128
    cap = (LHS_BLOCK_BUDGET // (2 * K)) // 16 * 16    # bf16 LHS block <= budget
    cap = max(128, min(TM_MAX, cap))
    tm = min(cap, _round_up(M, 16))                   # multiple of 16 (bf16 tiling)
    return tm, tn


# ------------------------------------------------------------------
# Fused matmul + folded-BN bias + optional residual + leaky-ReLU
# ------------------------------------------------------------------
def _fused_matmul_kernel(a_ref, w_ref, bias_ref, *rest, add_residual, apply_act):
    if add_residual:
        res_ref, o_ref = rest
    else:
        (o_ref,) = rest
    # bf16 x bf16 -> fp32 on the MXU; epilogue stays in fp32.
    acc = jnp.dot(a_ref[...], w_ref[...], preferred_element_type=jnp.float32)
    y = acc + bias_ref[...]
    if add_residual:
        y = y + res_ref[...].astype(jnp.float32)
    if apply_act:
        y = jnp.where(y >= 0, y, LEAKY_SLOPE * y)
    o_ref[...] = y.astype(o_ref.dtype)


def fused_matmul(a, w, bias, out_dim, residual=None, apply_act=True,
                 out_dtype=jnp.bfloat16):
    """out = act((a @ w)[:, :out_dim] + bias [+ residual]).

    a: (M, K) (cast to bf16 here if needed), w: (K, Np) bf16 with the BN scale
    folded in and Np = round_up(out_dim, 128) pre-padded at init,
    bias: (1, Np) fp32, residual: (M, out_dim) bf16 or None.
    Output has exact shape (M, out_dim); ragged edge tiles are handled by
    Pallas masked stores, so no HBM pad / un-pad copies are needed.

    All K values in this network are <= 4608, so the full reduction depth fits
    in a single VMEM block per tile (no K grid axis / accumulator needed).
    """
    M, K = a.shape
    Np = w.shape[1]
    a = a.astype(jnp.bfloat16)

    tm, tn = _pick_tiles(M, K, Np)
    grid = (pl.cdiv(M, tm), pl.cdiv(out_dim, tn))

    in_specs = [
        pl.BlockSpec((tm, K), lambda i, j: (i, 0)),   # full K in one block
        pl.BlockSpec((K, tn), lambda i, j: (0, j)),
        pl.BlockSpec((1, tn), lambda i, j: (0, j)),
    ]
    args = [a, w, bias]
    if residual is not None:
        in_specs.append(pl.BlockSpec((tm, tn), lambda i, j: (i, j)))
        args.append(residual.astype(jnp.bfloat16))    # promoted to fp32 in-kernel

    kernel = functools.partial(_fused_matmul_kernel,
                               add_residual=residual is not None,
                               apply_act=apply_act)
    return pl.pallas_call(
        kernel,
        out_shape=jax.ShapeDtypeStruct((M, out_dim), out_dtype),
        grid=grid,
        in_specs=in_specs,
        out_specs=pl.BlockSpec((tm, tn), lambda i, j: (i, j)),
        compiler_params=pltpu.CompilerParams(
            dimension_semantics=("parallel", "parallel")),
    )(*args)


# ------------------------------------------------------------------
# MaxPool 3x3 stride 2 pad 1 (mod1 pool) -- tiled grid, 9 shifted bf16 slices
# ------------------------------------------------------------------
def _maxpool_kernel(*refs):
    o_ref = refs[-1]
    m = refs[0][...]
    for r in refs[1:-1]:
        m = jnp.maximum(m, r[...])
    o_ref[...] = m


def maxpool_3x3_s2_p1(x):
    # x: [N, H, W, C] bf16 -> [N, Ho, Wo, C] bf16
    N, H, W, C = x.shape
    Ho = (H + 2 - 3) // 2 + 1
    Wo = (W + 2 - 3) // 2 + 1
    xp = jnp.pad(x, ((0, 0), (1, 1), (1, 1), (0, 0)),
                 constant_values=-jnp.inf)
    M = N * Ho * Wo
    slices = []
    for i in range(3):
        for j in range(3):
            slices.append(
                xp[:, i:i + 2 * (Ho - 1) + 1:2,
                   j:j + 2 * (Wo - 1) + 1:2, :].reshape(M, C))
    tmb = min(512, _round_up(M, 16))
    out = pl.pallas_call(
        _maxpool_kernel,
        out_shape=jax.ShapeDtypeStruct((M, C), x.dtype),
        grid=(pl.cdiv(M, tmb),),
        in_specs=[pl.BlockSpec((tmb, C), lambda i: (i, 0))] * 9,
        out_specs=pl.BlockSpec((tmb, C), lambda i: (i, 0)),
        compiler_params=pltpu.CompilerParams(
            dimension_semantics=("parallel",)),
    )(*slices)
    return out.reshape(N, Ho, Wo, C)


# ------------------------------------------------------------------
# Global average pool (classifier head) -- tiny, lane-dense (C last)
# ------------------------------------------------------------------
def _gap_kernel(x_ref, o_ref):
    hw = x_ref.shape[1]
    o_ref[...] = jnp.sum(x_ref[...].astype(jnp.float32), axis=1) * (1.0 / hw)


def global_avg_pool(x):
    N, H, W, C = x.shape
    xs = x.reshape(N, H * W, C)
    return pl.pallas_call(
        _gap_kernel,
        out_shape=jax.ShapeDtypeStruct((N, C), jnp.float32),
        grid=(1,),
        in_specs=[pl.BlockSpec((N, H * W, C), lambda i: (0, 0, 0))],
        out_specs=pl.BlockSpec((N, C), lambda i: (0, 0)),
    )(xs)


# ------------------------------------------------------------------
# Conv glue: bf16 matmul LHS construction feeding the fused Pallas matmul
# ------------------------------------------------------------------
def _conv_inputs(x, kh, kw, stride, padding, dilation):
    """Return the (M, K) bf16 matmul LHS and output spatial dims.

    1x1 convolutions bypass im2col entirely; kxk convolutions build the
    im2col matrix with a single bf16 concatenate (no extra pad copy).
    """
    N, H, W, C = x.shape
    Ho = (H + 2 * padding - dilation * (kh - 1) - 1) // stride + 1
    Wo = (W + 2 * padding - dilation * (kw - 1) - 1) // stride + 1
    xb = x.astype(jnp.bfloat16)
    if kh == 1 and kw == 1 and padding == 0:
        if stride != 1:
            xb = xb[:, ::stride, ::stride, :]
        return xb.reshape(N * Ho * Wo, C), (N, Ho, Wo)
    xp = jnp.pad(xb, ((0, 0), (padding, padding), (padding, padding), (0, 0)))
    cols = []
    for i in range(kh):
        for j in range(kw):
            hs, ws = i * dilation, j * dilation
            cols.append(xp[:, hs:hs + stride * (Ho - 1) + 1:stride,
                           ws:ws + stride * (Wo - 1) + 1:stride, :])
    a = jnp.concatenate(cols, axis=-1)         # (N, Ho, Wo, kh*kw*C)
    return a.reshape(N * Ho * Wo, kh * kw * C), (N, Ho, Wo)


def conv_bn(x, p, stride=1, padding=0, dilation=1, apply_act=True,
            residual=None):
    a, (N, Ho, Wo) = _conv_inputs(x, p['kh'], p['kw'], stride, padding, dilation)
    res = residual.reshape(N * Ho * Wo, -1) if residual is not None else None
    out = fused_matmul(a, p['w'], p['bias'], p['cout'], res, apply_act)
    return out.reshape(N, Ho, Wo, p['cout'])


def residual_block(x, blk, stride, dilation):
    # Bottleneck ResidualBlock: conv1(1x1,stride)->bn1(act) -> conv2(3x3)
    # ->bn2(act) -> conv3(1x1)->bn3(identity); shortcut = proj_conv+proj_bn
    # (identity act) or x; out = leaky_relu(convs(x) + shortcut)  (the fused
    # kernel adds the residual before applying the activation).
    if 'proj' in blk:
        res = conv_bn(x, blk['proj'], stride=stride, apply_act=False)
    else:
        res = x
    h = conv_bn(x, blk['conv1'], stride=stride, apply_act=True)
    h = conv_bn(h, blk['conv2'], stride=1, padding=dilation,
                dilation=dilation, apply_act=True)
    out = conv_bn(h, blk['conv3'], stride=1, apply_act=True, residual=res)
    return out


# ------------------------------------------------------------------
# Deterministic parameter init (synthetic; BN folded, pre-padded, pre-cast)
# ------------------------------------------------------------------
def init_conv_bn(key, kh, kw, cin, cout):
    ks = jax.random.split(key, 5)
    fan_in = kh * kw * cin
    w = jax.random.normal(ks[0], (kh, kw, cin, cout),
                          jnp.float32) / math.sqrt(fan_in)
    gamma = jax.random.uniform(ks[1], (cout,), jnp.float32, 0.5, 1.5)
    beta = 0.1 * jax.random.normal(ks[2], (cout,), jnp.float32)
    mean = 0.1 * jax.random.normal(ks[3], (cout,), jnp.float32)
    var = jax.random.uniform(ks[4], (cout,), jnp.float32, 0.5, 1.5)
    scale = gamma / jnp.sqrt(var + BN_EPS)
    bias = beta - mean * scale
    # Fold BN scale into the weight, pre-pad Cout to a lane multiple and
    # pre-cast to bf16 once so the kernel epilogue is just bias (+res) + act.
    w_folded = w.reshape(fan_in, cout) * scale[None, :]
    n_pad = _round_up(cout, 128)
    w_p = jnp.zeros((fan_in, n_pad), jnp.bfloat16)
    w_p = w_p.at[:, :cout].set(w_folded.astype(jnp.bfloat16))
    b_p = jnp.zeros((1, n_pad), jnp.float32).at[:, :cout].set(bias[None, :])
    return dict(w=w_p, bias=b_p, kh=kh, kw=kw, cout=cout)


def init_params(key):
    keys = iter(jax.random.split(key, 64))
    params = {'mod1': init_conv_bn(next(keys), 7, 7, 3, 64)}  # caffe_mode=False
    in_c = 64
    channels = (64, 64, 256)
    for mod_id, num in enumerate(STRUCTURE):
        blocks = []
        for block_id in range(num):
            stride = 2 if (mod_id > 0 and block_id == 0) else 1
            blk = {
                'conv1': init_conv_bn(next(keys), 1, 1, in_c, channels[0]),
                'conv2': init_conv_bn(next(keys), 3, 3, channels[0], channels[1]),
                'conv3': init_conv_bn(next(keys), 1, 1, channels[1], channels[2]),
            }
            if stride != 1 or in_c != channels[-1]:
                blk['proj'] = init_conv_bn(next(keys), 1, 1, in_c, channels[-1])
            blocks.append(blk)
            in_c = channels[-1]
        params['mod%d' % (mod_id + 2)] = blocks
        channels = tuple(c * 2 for c in channels)
    if CLASSES:
        kw_, kb_ = jax.random.split(next(keys))
        fc_w = jax.random.normal(kw_, (in_c, CLASSES),
                                 jnp.float32) / math.sqrt(in_c)
        fc_b = 0.1 * jax.random.normal(kb_, (1, CLASSES), jnp.float32)
        n_pad = _round_up(CLASSES, 128)
        params['fc_w'] = jnp.zeros((in_c, n_pad), jnp.bfloat16).at[
            :, :CLASSES].set(fc_w.astype(jnp.bfloat16))
        params['fc_b'] = jnp.zeros((1, n_pad), jnp.float32).at[
            :, :CLASSES].set(fc_b)
    return params


# ------------------------------------------------------------------
# Full forward pass (returns OrderedDict-like dict, NCHW fp32 feature maps)
# ------------------------------------------------------------------
def resnet_forward(x_nchw, params):
    x = jnp.transpose(x_nchw, (0, 2, 3, 1)).astype(jnp.bfloat16)  # NCHW -> NHWC
    outs = {}
    # mod1: conv1(7x7,s2,p3, no bias) -> bn1(leaky_relu) -> pool1 (dilation==1)
    h = conv_bn(x, params['mod1'], stride=2, padding=3, apply_act=True)
    h = maxpool_3x3_s2_p1(h)
    outs['mod1'] = h
    for mod_id in range(4):
        for block_id in range(STRUCTURE[mod_id]):
            stride = 2 if (mod_id > 0 and block_id == 0) else 1
            h = residual_block(h, params['mod%d' % (mod_id + 2)][block_id],
                               stride, 1)
        outs['mod%d' % (mod_id + 2)] = h
    result = {k: jnp.transpose(v, (0, 3, 1, 2)).astype(jnp.float32)
              for k, v in outs.items()}
    if CLASSES:
        g = global_avg_pool(h)
        result['classifier'] = fused_matmul(g, params['fc_w'], params['fc_b'],
                                            CLASSES, None, apply_act=False,
                                            out_dtype=jnp.float32)
    # TODO(synk): dropout (inactive here: dropout=None) and BN batch-stats
    # training mode are not modeled; BN uses folded eval-mode running stats.
    return result


if __name__ == "__main__":
    key = jax.random.PRNGKey(0)
    pkey, xkey = jax.random.split(key)
    params = init_params(pkey)
    x = jax.random.normal(xkey, (2, 3, 64, 64), jnp.float32)  # NCHW like torch
    outs = resnet_forward(x, params)
    jax.block_until_ready(outs)
    print("KERNEL_OK")
</pallas_src>

<mosaic_0001>
module attributes {stable_mosaic.version = 11 : i64} {
  func.func @_fused_matmul_kernel(%arg0: i32, %arg1: i32, %arg2: memref<1024x147xbf16, #tpu.memory_space<vmem>>, %arg3: memref<147x128xbf16, #tpu.memory_space<vmem>>, %arg4: memref<1x128xf32, #tpu.memory_space<vmem>>, %arg5: memref<1024x128xbf16, #tpu.memory_space<vmem>>) attributes {dimension_semantics = [#tpu.dimension_semantics<parallel>, #tpu.dimension_semantics<parallel>], iteration_bounds = array<i64: 2, 1>, scalar_prefetch = 0 : i64, scratch_operands = 0 : i64, tpu.core_type = #tpu.core_type<tc>, window_params = [{transform_indices = @transform_0, window_bounds = array<i64: 1024, 147>}, {transform_indices = @transform_1, window_bounds = array<i64: 147, 128>}, {transform_indices = @transform_2, window_bounds = array<i64: 1, 128>}, {transform_indices = @transform_3, window_bounds = array<i64: 1024, 128>}]} {
    %c0 = arith.constant 0 : index
    %c0_0 = arith.constant 0 : index
    %0 = vector.load %arg2[%c0, %c0_0] : memref<1024x147xbf16, #tpu.memory_space<vmem>>, vector<1024x147xbf16>
    %c0_1 = arith.constant 0 : index
    %c0_2 = arith.constant 0 : index
    %1 = vector.load %arg3[%c0_1, %c0_2] : memref<147x128xbf16, #tpu.memory_space<vmem>>, vector<147x128xbf16>
    %cst = arith.constant dense<0.000000e+00> : vector<1024x128xf32>
    %2 = tpu.matmul %0, %1, %cst {dimension_numbers = #tpu.dot_dimension_numbers<[1], [0], [0], [1], [0, 0, 1, 1], [], []>} : vector<1024x147xbf16>, vector<147x128xbf16>, vector<1024x128xf32> -> vector<1024x128xf32>
    %c0_3 = arith.constant 0 : index
    %c0_4 = arith.constant 0 : index
    %3 = vector.load %arg4[%c0_3, %c0_4] : memref<1x128xf32, #tpu.memory_space<vmem>>, vector<1x128xf32>
    %4 = vector.broadcast %3 : vector<1x128xf32> to vector<1024x128xf32>
    %5 = arith.addf %2, %4 : vector<1024x128xf32>
    %cst_5 = arith.constant 0.000000e+00 : f32
    %6 = vector.broadcast %cst_5 : f32 to vector<1024x128xf32>
    %7 = arith.cmpf oge, %5, %6 : vector<1024x128xf32>
    %cst_6 = arith.constant 0.00999999977 : f32
    %8 = vector.broadcast %cst_6 : f32 to vector<1024x128xf32>
    %9 = arith.mulf %8, %5 : vector<1024x128xf32>
    %10 = arith.select %7, %5, %9 : vector<1024x128xi1>, vector<1024x128xf32>
    %11 = arith.truncf %10 : vector<1024x128xf32> to vector<1024x128xbf16>
    %c0_7 = arith.constant 0 : index
    %c0_8 = arith.constant 0 : index
    %12 = vector.load %arg5[%c0_7, %c0_8] : memref<1024x128xbf16, #tpu.memory_space<vmem>>, vector<1024x128xbf16>
    tpu.vector_store %arg5[%c0_7, %c0_8], %11 {strides = array<i32>} : memref<1024x128xbf16, #tpu.memory_space<vmem>>, vector<1024x128xbf16>,
    return
  }
  func.func @transform_0(%arg0: i32, %arg1: i32) -> (i32, i32) {
    %c0_i32 = arith.constant 0 : i32
    %c0_i32_0 = arith.constant 0 : i32
    return %arg0, %c0_i32 : i32, i32
  }
  func.func @transform_1(%arg0: i32, %arg1: i32) -> (i32, i32) {
    %c0_i32 = arith.constant 0 : i32
    %c0_i32_0 = arith.constant 0 : i32
    return %c0_i32, %arg1 : i32, i32
  }
  func.func @transform_2(%arg0: i32, %arg1: i32) -> (i32, i32) {
    %c0_i32 = arith.constant 0 : i32
    %c0_i32_0 = arith.constant 0 : i32
    return %c0_i32, %arg1 : i32, i32
  }
  func.func @transform_3(%arg0: i32, %arg1: i32) -> (i32, i32) {
    %c0_i32 = arith.constant 0 : i32
    return %arg0, %arg1 : i32, i32
  }
}

</mosaic_0001>

<bundles_post_ra>
// kernel: tpu_custom_call.1
= control target key start
LH: loop header
LB: loop body
LE: loop exit
PB: predicated region body
PF: predicated region fallthrough
CT: control target
= control target key end

     0   :  { %s4039_s12 = smov 0   ;;  %s4041_s13 = smov 0   ;;  %s4504_s0 = inlined_call_operand.vmem [shape: bf16[2048,147], index: 0, kind: input, shape index: {}]   ;;  %s4505_s1 = inlined_call_operand.vmem [shape: bf16[147,128], index: 1, kind: input, shape index: {}]   ;;  %s4506_s2 = inlined_call_operand.vmem [shape: f32[1,128], index: 2, kind: input, shape index: {}]   ;;  %s4507_s3 = inlined_call_operand.vmem [shape: bf16[2048,64], index: 3, kind: output, shape index: {}]  }
   0x1   :  { %s4043_s14 = smov 0  }
   0x2 LB: > { %s25_s15 = sadd.s32 1, %s4011_s13  ;;  %p2893_p0 = scmp.ge.s32.totalorder %s4015_s14, 1  ;;  %s4015_s14 = sphi %s4043_s14, %s13_s14   ;;  %s4011_s13 = sphi %s4041_s13, %s4509_s13   ;;  %s4007_s12 = sphi %s4039_s12, %s4508_s12  }
   0x3   : > { %p27_p1 = scmp.ge.s32.totalorder %s25_s15, 2  ;;  %p170_p2 = scmp.lt.s32.totalorder %s4015_s14, 3 }
   0x5   : > { %s4511_s15 = smov (%p27_p1, %s25_s15), 0  ;;  %p171_p3 = pnand %p2893_p0, %p170_p2 }
   0x6   : > { %v3790_v0 = vld [vmem:[%s4505_s1] sm:$0xff] (!%p171_p3)   ;;  %v4017_v1 = vmov (!%p171_p3), 0   ;;  %v3791_v2 = vld [vmem:[%s4505_s1 + $0x8] sm:$0xff] (!%p171_p3)   ;;  %v3792_v3 = vld [vmem:[%s4505_s1 + $0x10] sm:$0xff] (!%p171_p3)   ;;  %s2894_s22 = sshll.u32 (!%p171_p3), %s4007_s12, 7  ;;  %vm1016_vm0 = vcmask (!%p171_p3), 154624  }
   0x7   : > { %174 = sbr.rel (%p171_p3) target bundleno = 517 (0x205), region = 32  ;;  %1216 = vmatprep.subr.bf16.mxu0 (!%p171_p3), %v4017_v1  ;;  %3744 = vmatprep.subr.bf16.mxu1 (!%p171_p3), %v4017_v1  ;;  %p206_p4 = scmp.lt.s32.totalorder (!%p171_p3), %s2894_s22, 255  ;;  %v3793_v4 = vld [vmem:[%s4505_s1 + $0x18] sm:$0xff] (!%p171_p3)   ;;  %v3794_v5 = vld [vmem:[%s4505_s1 + $0x20] sm:$0xff] (!%p171_p3)   ;;  %v3795_v8 = vld [vmem:[%s4505_s1 + $0x28] sm:$0xff] (!%p171_p3)   ;;  %vm1209_vm1 = vcmask (!%p171_p3), 1040384  }
   0x8   : > { %1217 = vmatpush1.bf16.msra.mxu0 (!%p171_p3), %v3790_v0  ;;  %3754 = vmatpush1.bf16.msra.mxu1 (!%p171_p3), %v3790_v0  ;;  %v3796_v9 = vld [vmem:[%s4505_s1 + $0x30] sm:$0xff] (!%p171_p3)   ;;  %v3797_v10 = vld [vmem:[%s4505_s1 + $0x38] sm:$0xff] (!%p171_p3)   ;;  %vm1210_vm2 = vcmask (!%p171_p3), 1041408   ;;  %v4018_v11 = vmov (!%p171_p3), 65535   ;;  %v3798_v13 = vld [vmem:[%s4505_s1 + $0x40] sm:$0xff] (!%p171_p3)  }
   0x9   : > { %1218 = vmatprep.subr.bf16.mxu0 (!%p171_p3), %v4017_v1  ;;  %3745 = vmatprep.subr.bf16.mxu1 (!%p171_p3), %v4017_v1  ;;  %v1211_v12 = vsel (!%p171_p3), %vm1209_vm1, 4294967295, %v4018_v11  ;;  %v3799_v14 = vld [vmem:[%s4505_s1 + $0x48] ss:$0 sps:$4 sm:$0x33] (!%p171_p3)  }
   0xa   : > { %v1212_v15 = vsel (!%p171_p3), %vm1210_vm2, %v1211_v12, 0 }
   0xb   : > { %v1214_v16 = vand.u32 (!%p171_p3), %v3799_v14, %v1212_v15 }
   0xc   : > { %1219 = vmatpush1.bf16.msra.mxu0 (!%p171_p3), %v3791_v2  ;;  %3755 = vmatpush1.bf16.msra.mxu1 (!%p171_p3), %v3791_v2 }
   0xd   : > { %1220 = vmatprep.subr.bf16.mxu0 (!%p171_p3), %v4017_v1  ;;  %3746 = vmatprep.subr.bf16.mxu1 (!%p171_p3), %v4017_v1 }
   0xe   : > { %s4513_s22 = smov (!%p206_p4, %s2894_s22), 255 }
   0xf   : > { %s3232_s25 = sshll.u32 %s4513_s22, 3  ;;  %s2898_s19 = sshll.u32 %s4513_s22, 2 }
  0x10   : > { %1221 = vmatpush1.bf16.msra.mxu0 %v3792_v3  ;;  %3756 = vmatpush1.bf16.msra.mxu1 %v3792_v3  ;;  %s4075_s28 = scalar_lea.vmem %s4504_s0, %s3232_s25  ;;  %s4280_s23 = scalar_lea.vmem %s4507_s3, %s2898_s19 }
  0x11   : > { %1222 = vmatprep.subr.bf16.mxu0 %v4017_v1  ;;  %3747 = vmatprep.subr.bf16.mxu1 %v4017_v1  ;;  %v3802_v6 = vld [vmem:[%s4075_s28 + $0x4] ss:$8 sps:$4 sm:$0xff]   ;;  %v3800_v17 = vld [vmem:[%s4075_s28] ss:$8 sps:$4 sm:$0xff]   ;;  %v3806_v19 = vld [vmem:[%s4075_s28 + $0x14] ss:$8 sps:$4 sm:$0xff]  }
  0x12   : > { %v3805_v7 = vld [vmem:[%s4075_s28 + $0x204] ss:$8 sps:$4 sm:$0xff]   ;;  %3038 = vmatprep.mubr.msk.bf16.mxu0 %vm1016_vm0, %v3802_v6  ;;  %v3803_v18 = vld [vmem:[%s4075_s28 + $0x200] ss:$8 sps:$4 sm:$0xff]   ;;  %v3808_v20 = vld [vmem:[%s4075_s28 + $0x214] ss:$8 sps:$4 sm:$0xff]  }
  0x13   : > { %3070 = vmatprep.mubr.msk.bf16.mxu1 %vm1016_vm0, %v3805_v7  ;;  %v3810_v21 = vld [vmem:[%s4075_s28 + $0x10] ss:$8 sps:$4 sm:$0xff]   ;;  %v3812_v23 = vld [vmem:[%s4075_s28 + $0x24] ss:$8 sps:$4 sm:$0xff]   ;;  %v3816_v25 = vld [vmem:[%s4075_s28 + $0x20] ss:$8 sps:$4 sm:$0xff]  }
  0x14   : > { %1223 = vmatpush1.bf16.msra.mxu0 %v3793_v4  ;;  %3757 = vmatpush1.bf16.msra.mxu1 %v3793_v4  ;;  %v3811_v22 = vld [vmem:[%s4075_s28 + $0x210] ss:$8 sps:$4 sm:$0xff]   ;;  %v3814_v24 = vld [vmem:[%s4075_s28 + $0x224] ss:$8 sps:$4 sm:$0xff]   ;;  %v3817_v26 = vld [vmem:[%s4075_s28 + $0x220] ss:$8 sps:$4 sm:$0xff]  }
  0x15   : > { %1224 = vmatprep.subr.bf16.mxu0 %v4017_v1  ;;  %3748 = vmatprep.subr.bf16.mxu1 %v4017_v1  ;;  %v3818_v27 = vld [vmem:[%s4075_s28 + $0x34] ss:$8 sps:$4 sm:$0xff]   ;;  %v3822_v29 = vld [vmem:[%s4075_s28 + $0x30] ss:$8 sps:$4 sm:$0xff]   ;;  %v3824_v31 = vld [vmem:[%s4075_s28 + $0x44] ss:$8 sps:$4 sm:$0xff]  }
  0x16   : > { %v3820_v28 = vld [vmem:[%s4075_s28 + $0x234] ss:$8 sps:$4 sm:$0xff]   ;;  %v3823_v30 = vld [vmem:[%s4075_s28 + $0x230] ss:$8 sps:$4 sm:$0xff]   ;;  %v3826_v32 = vld [vmem:[%s4075_s28 + $0x244] ss:$8 sps:$4 sm:$0xff]  }
  0x17   : > { %v3828_v33 = vld [vmem:[%s4075_s28 + $0x40] ss:$8 sps:$4 sm:$0xff]   ;;  %v3830_v35 = vld [vmem:[%s4075_s28 + $0x54] ss:$8 sps:$4 sm:$0xff]   ;;  %v3834_v37 = vld [vmem:[%s4075_s28 + $0x50] ss:$8 sps:$4 sm:$0xff]  }
  0x18   : > { %1225 = vmatpush1.bf16.msra.mxu0 %v3794_v5  ;;  %3758 = vmatpush1.bf16.msra.mxu1 %v3794_v5  ;;  %v3829_v34 = vld [vmem:[%s4075_s28 + $0x240] ss:$8 sps:$4 sm:$0xff]   ;;  %v3832_v36 = vld [vmem:[%s4075_s28 + $0x254] ss:$8 sps:$4 sm:$0xff]   ;;  %v3835_v38 = vld [vmem:[%s4075_s28 + $0x250] ss:$8 sps:$4 sm:$0xff]  }
  0x19   : > { %1226 = vmatprep.subr.bf16.mxu0 %v4017_v1  ;;  %3749 = vmatprep.subr.bf16.mxu1 %v4017_v1  ;;  %v3836_v39 = vld [vmem:[%s4075_s28 + $0x64] ss:$8 sps:$4 sm:$0xff]   ;;  %v3840_v41 = vld [vmem:[%s4075_s28 + $0x60] ss:$8 sps:$4 sm:$0xff]   ;;  %v3842_v43 = vld [vmem:[%s4075_s28 + $0x74] ss:$8 sps:$4 sm:$0xff]  }
  0x1a   : > { %v3838_v40 = vld [vmem:[%s4075_s28 + $0x264] ss:$8 sps:$4 sm:$0xff]   ;;  %v3841_v42 = vld [vmem:[%s4075_s28 + $0x260] ss:$8 sps:$4 sm:$0xff]   ;;  %v3844_v44 = vld [vmem:[%s4075_s28 + $0x274] ss:$8 sps:$4 sm:$0xff]  }
  0x1b   : > { %v3846_v45 = vld [vmem:[%s4075_s28 + $0x70] ss:$8 sps:$4 sm:$0xff]   ;;  %v3848_v47 = vld [vmem:[%s4075_s28 + $0x84] ss:$8 sps:$4 sm:$0xff]   ;;  %v3852_v49 = vld [vmem:[%s4075_s28 + $0x80] ss:$8 sps:$4 sm:$0xff]  }
  0x1c   : > { %1227 = vmatpush1.bf16.msra.mxu0 %v3795_v8  ;;  %3759 = vmatpush1.bf16.msra.mxu1 %v3795_v8  ;;  %v3847_v46 = vld [vmem:[%s4075_s28 + $0x270] ss:$8 sps:$4 sm:$0xff]   ;;  %v3850_v48 = vld [vmem:[%s4075_s28 + $0x284] ss:$8 sps:$4 sm:$0xff]   ;;  %v3853_v50 = vld [vmem:[%s4075_s28 + $0x280] ss:$8 sps:$4 sm:$0xff]  }
  0x1d   : > { %1228 = vmatprep.subr.bf16.mxu0 %v4017_v1  ;;  %3750 = vmatprep.subr.bf16.mxu1 %v4017_v1  ;;  %v3854_v51 = vld [vmem:[%s4075_s28 + $0x94] ss:$8 sps:$4 sm:$0xff]   ;;  %v3858_v53 = vld [vmem:[%s4075_s28 + $0x90] ss:$8 sps:$4 sm:$0xff]   ;;  %v3860_v55 = vld [vmem:[%s4075_s28 + $0xa4] ss:$8 sps:$4 sm:$0xff]  }
  0x1e   : > { %v3856_v52 = vld [vmem:[%s4075_s28 + $0x294] ss:$8 sps:$4 sm:$0xff]   ;;  %v3859_v54 = vld [vmem:[%s4075_s28 + $0x290] ss:$8 sps:$4 sm:$0xff]   ;;  %v3862_v56 = vld [vmem:[%s4075_s28 + $0x2a4] ss:$8 sps:$4 sm:$0xff]  }
  0x1f   : > { %v3864_v57 = vld [vmem:[%s4075_s28 + $0xa0] ss:$8 sps:$4 sm:$0xff]   ;;  %v3866_v59 = vld [vmem:[%s4075_s28 + $0xb4] ss:$8 sps:$4 sm:$0xff]   ;;  %v3870_v61 = vld [vmem:[%s4075_s28 + $0xb0] ss:$8 sps:$4 sm:$0xff]  }
  0x20   : > { %1229 = vmatpush1.bf16.msra.mxu0 %v3796_v9  ;;  %3760 = vmatpush1.bf16.msra.mxu1 %v3796_v9  ;;  %v3865_v58 = vld [vmem:[%s4075_s28 + $0x2a0] ss:$8 sps:$4 sm:$0xff]   ;;  %v3868_v60 = vld [vmem:[%s4075_s28 + $0x2b4] ss:$8 sps:$4 sm:$0xff]   ;;  %v3871_v62 = vld [vmem:[%s4075_s28 + $0x2b0] ss:$8 sps:$4 sm:$0xff]  }
  0x21   : > { %1230 = vmatprep.subr.bf16.mxu0 %v4017_v1  ;;  %3751 = vmatprep.subr.bf16.mxu1 %v4017_v1  ;;  %v3872_v63 = vld [vmem:[%s4075_s28 + $0xc4] ss:$8 sps:$4 sm:$0xff]   ;;  %v3877_v2 = vld [vmem:[%s4075_s28 + $0x2c0] ss:$8 sps:$4 sm:$0xff]   ;;  %v3878_v3 = vld [vmem:[%s4075_s28 + $0xd4] ss:$8 sps:$4 sm:$0xff]  }
  0x22   : > { %v3874_v0 = vld [vmem:[%s4075_s28 + $0x2c4] ss:$8 sps:$4 sm:$0xff]   ;;  %v3880_v4 = vld [vmem:[%s4075_s28 + $0x2d4] ss:$8 sps:$4 sm:$0xff]   ;;  %v3882_v5 = vld [vmem:[%s4075_s28 + $0xd0] ss:$8 sps:$4 sm:$0xff]  }
  0x23   : > { %v3883_v6 = vld [vmem:[%s4075_s28 + $0x2d0] ss:$8 sps:$4 sm:$0xff]   ;;  %v3884_v7 = vld [vmem:[%s4075_s28 + $0xe4] ss:$8 sps:$4 sm:$0xff]   ;;  %v3888_v9 = vld [vmem:[%s4075_s28 + $0xe0] ss:$8 sps:$4 sm:$0xff]  }
  0x24   : > { %1231 = vmatpush1.bf16.msra.mxu0 %v3797_v10  ;;  %3761 = vmatpush1.bf16.msra.mxu1 %v3797_v10  ;;  %v3886_v8 = vld [vmem:[%s4075_s28 + $0x2e4] ss:$8 sps:$4 sm:$0xff]   ;;  %v3889_v10 = vld [vmem:[%s4075_s28 + $0x2e0] ss:$8 sps:$4 sm:$0xff]   ;;  %v3890_v11 = vld [vmem:[%s4075_s28 + $0xf4] ss:$8 sps:$4 sm:$0xff]  }
  0x25   : > { %1232 = vmatprep.subr.bf16.mxu0 %v4017_v1  ;;  %3752 = vmatprep.subr.bf16.mxu1 %v4017_v1  ;;  %v3892_v12 = vld [vmem:[%s4075_s28 + $0x2f4] ss:$8 sps:$4 sm:$0xff]   ;;  %v3895_v14 = vld [vmem:[%s4075_s28 + $0x2f0] ss:$8 sps:$4 sm:$0xff]   ;;  %v3896_v15 = vld [vmem:[%s4075_s28 + $0x104] ss:$8 sps:$4 sm:$0xff]  }
  0x28   : > { %1233 = vmatpush1.bf16.msra.mxu0 %v3798_v13  ;;  %3762 = vmatpush1.bf16.msra.mxu1 %v3798_v13  ;;  %v3894_v13 = vld [vmem:[%s4075_s28 + $0xf0] ss:$8 sps:$4 sm:$0xff]  }
  0x29   : > { %1234 = vmatprep.subr.bf16.mxu0 %v4017_v1  ;;  %3753 = vmatprep.subr.bf16.mxu1 %v4017_v1  ;;  %v3876_v1 = vld [vmem:[%s4075_s28 + $0xc0] ss:$8 sps:$4 sm:$0xff]  }
  0x2c   : > { %1235 = vmatpush1.bf16.msra.mxu0 %v1214_v16  ;;  %3763 = vmatpush1.bf16.msra.mxu1 %v1214_v16  ;;  %v3898_v16 = vld [vmem:[%s4075_s28 + $0x304] ss:$8 sps:$4 sm:$0xff]  }
  0x2f   : > { %1249 = vmatmul.mubr.bf16.vlgmr.msra.gmra.mrb[0].mxu0 %v3800_v17  ;;  %1505 = vmatmul.mubr.bf16.vlgmr.msra.gmra.mrb[0].mxu1 %v3803_v18  ;;  %v3900_v17 = vld [vmem:[%s4075_s28 + $0x100] ss:$8 sps:$4 sm:$0xff]  }
  0x30   : > { %3039 = vmatprep.mubr.msk.bf16.mxu0 %vm1016_vm0, %v3806_v19  ;;  %3071 = vmatprep.mubr.msk.bf16.mxu1 %vm1016_vm0, %v3808_v20  ;;  %v3901_v18 = vld [vmem:[%s4075_s28 + $0x300] ss:$8 sps:$4 sm:$0xff]   ;;  %v3902_v19 = vld [vmem:[%s4075_s28 + $0x114] ss:$8 sps:$4 sm:$0xff]  }
  0x31   : > { %v3904_v20 = vld [vmem:[%s4075_s28 + $0x314] ss:$8 sps:$4 sm:$0xff]  }
  0x37   : > { %1257 = vmatmul.mubr.bf16.gmra.mrb[4].mxu0 %v3810_v21  ;;  %1513 = vmatmul.mubr.bf16.gmra.mrb[4].mxu1 %v3811_v22  ;;  %v3906_v21 = vld [vmem:[%s4075_s28 + $0x110] ss:$8 sps:$4 sm:$0xff]  }
  0x38   : > { %3040 = vmatprep.mubr.msk.bf16.mxu0 %vm1016_vm0, %v3812_v23  ;;  %3072 = vmatprep.mubr.msk.bf16.mxu1 %vm1016_vm0, %v3814_v24  ;;  %v3907_v22 = vld [vmem:[%s4075_s28 + $0x310] ss:$8 sps:$4 sm:$0xff]   ;;  %v3908_v23 = vld [vmem:[%s4075_s28 + $0x124] ss:$8 sps:$4 sm:$0xff]  }
  0x39   : > { %v3910_v24 = vld [vmem:[%s4075_s28 + $0x324] ss:$8 sps:$4 sm:$0xff]  }
  0x3f   : > { %1265 = vmatmul.mubr.bf16.gmra.mrb[8].mxu0 %v3816_v25  ;;  %1521 = vmatmul.mubr.bf16.gmra.mrb[8].mxu1 %v3817_v26  ;;  %v3912_v25 = vld [vmem:[%s4075_s28 + $0x120] ss:$8 sps:$4 sm:$0xff]  }
  0x40   : > { %3041 = vmatprep.mubr.msk.bf16.mxu0 %vm1016_vm0, %v3818_v27  ;;  %3073 = vmatprep.mubr.msk.bf16.mxu1 %vm1016_vm0, %v3820_v28  ;;  %v3913_v26 = vld [vmem:[%s4075_s28 + $0x320] ss:$8 sps:$4 sm:$0xff]   ;;  %v3914_v27 = vld [vmem:[%s4075_s28 + $0x134] ss:$8 sps:$4 sm:$0xff]  }
  0x41   : > { %v3916_v28 = vld [vmem:[%s4075_s28 + $0x334] ss:$8 sps:$4 sm:$0xff]  }
  0x47   : > { %1273 = vmatmul.mubr.bf16.gmra.mrb[12].mxu0 %v3822_v29  ;;  %1529 = vmatmul.mubr.bf16.gmra.mrb[12].mxu1 %v3823_v30  ;;  %v3918_v29 = vld [vmem:[%s4075_s28 + $0x130] ss:$8 sps:$4 sm:$0xff]  }
  0x48   : > { %3042 = vmatprep.mubr.msk.bf16.mxu0 %vm1016_vm0, %v3824_v31  ;;  %3074 = vmatprep.mubr.msk.bf16.mxu1 %vm1016_vm0, %v3826_v32  ;;  %v3919_v30 = vld [vmem:[%s4075_s28 + $0x330] ss:$8 sps:$4 sm:$0xff]   ;;  %v3920_v31 = vld [vmem:[%s4075_s28 + $0x144] ss:$8 sps:$4 sm:$0xff]  }
  0x49   : > { %v3922_v32 = vld [vmem:[%s4075_s28 + $0x344] ss:$8 sps:$4 sm:$0xff]  }
  0x4f   : > { %1281 = vmatmul.mubr.bf16.gmra.mrb[16].mxu0 %v3828_v33  ;;  %1537 = vmatmul.mubr.bf16.gmra.mrb[16].mxu1 %v3829_v34  ;;  %v3924_v33 = vld [vmem:[%s4075_s28 + $0x140] ss:$8 sps:$4 sm:$0xff]  }
  0x50   : > { %3043 = vmatprep.mubr.msk.bf16.mxu0 %vm1016_vm0, %v3830_v35  ;;  %3075 = vmatprep.mubr.msk.bf16.mxu1 %vm1016_vm0, %v3832_v36  ;;  %v3925_v34 = vld [vmem:[%s4075_s28 + $0x340] ss:$8 sps:$4 sm:$0xff]   ;;  %v3926_v35 = vld [vmem:[%s4075_s28 + $0x154] ss:$8 sps:$4 sm:$0xff]  }
  0x51   : > { %v3928_v36 = vld [vmem:[%s4075_s28 + $0x354] ss:$8 sps:$4 sm:$0xff]  }
  0x57   : > { %1289 = vmatmul.mubr.bf16.gmra.mrb[20].mxu0 %v3834_v37  ;;  %1545 = vmatmul.mubr.bf16.gmra.mrb[20].mxu1 %v3835_v38  ;;  %v3930_v37 = vld [vmem:[%s4075_s28 + $0x150] ss:$8 sps:$4 sm:$0xff]  }
  0x58   : > { %3044 = vmatprep.mubr.msk.bf16.mxu0 %vm1016_vm0, %v3836_v39  ;;  %3076 = vmatprep.mubr.msk.bf16.mxu1 %vm1016_vm0, %v3838_v40  ;;  %v3931_v38 = vld [vmem:[%s4075_s28 + $0x350] ss:$8 sps:$4 sm:$0xff]   ;;  %v3932_v39 = vld [vmem:[%s4075_s28 + $0x164] ss:$8 sps:$4 sm:$0xff]  }
  0x59   : > { %v3934_v40 = vld [vmem:[%s4075_s28 + $0x364] ss:$8 sps:$4 sm:$0xff]  }
  0x5f   : > { %1297 = vmatmul.mubr.bf16.gmra.mrb[24].mxu0 %v3840_v41  ;;  %1553 = vmatmul.mubr.bf16.gmra.mrb[24].mxu1 %v3841_v42  ;;  %v3936_v41 = vld [vmem:[%s4075_s28 + $0x160] ss:$8 sps:$4 sm:$0xff]  }
  0x60   : > { %3045 = vmatprep.mubr.msk.bf16.mxu0 %vm1016_vm0, %v3842_v43  ;;  %3077 = vmatprep.mubr.msk.bf16.mxu1 %vm1016_vm0, %v3844_v44  ;;  %v3937_v42 = vld [vmem:[%s4075_s28 + $0x360] ss:$8 sps:$4 sm:$0xff]   ;;  %v3938_v43 = vld [vmem:[%s4075_s28 + $0x174] ss:$8 sps:$4 sm:$0xff]  }
  0x61   : > { %v3940_v44 = vld [vmem:[%s4075_s28 + $0x374] ss:$8 sps:$4 sm:$0xff]  }
  0x67   : > { %1305 = vmatmul.mubr.bf16.gmra.mrb[28].mxu0 %v3846_v45  ;;  %1561 = vmatmul.mubr.bf16.gmra.mrb[28].mxu1 %v3847_v46  ;;  %v3942_v45 = vld [vmem:[%s4075_s28 + $0x170] ss:$8 sps:$4 sm:$0xff]  }
  0x68   : > { %3046 = vmatprep.mubr.msk.bf16.mxu0 %vm1016_vm0, %v3848_v47  ;;  %3078 = vmatprep.mubr.msk.bf16.mxu1 %vm1016_vm0, %v3850_v48  ;;  %v3943_v46 = vld [vmem:[%s4075_s28 + $0x370] ss:$8 sps:$4 sm:$0xff]   ;;  %v3944_v47 = vld [vmem:[%s4075_s28 + $0x184] ss:$8 sps:$4 sm:$0xff]  }
  0x69   : > { %v3946_v48 = vld [vmem:[%s4075_s28 + $0x384] ss:$8 sps:$4 sm:$0xff]  }
  0x6f   : > { %1313 = vmatmul.mubr.bf16.gmra.mrb[32].mxu0 %v3852_v49  ;;  %1569 = vmatmul.mubr.bf16.gmra.mrb[32].mxu1 %v3853_v50  ;;  %v3948_v49 = vld [vmem:[%s4075_s28 + $0x180] ss:$8 sps:$4 sm:$0xff]  }
  0x70   : > { %3047 = vmatprep.mubr.msk.bf16.mxu0 %vm1016_vm0, %v3854_v51  ;;  %3079 = vmatprep.mubr.msk.bf16.mxu1 %vm1016_vm0, %v3856_v52  ;;  %v3949_v50 = vld [vmem:[%s4075_s28 + $0x380] ss:$8 sps:$4 sm:$0xff]   ;;  %v3950_v51 = vld [vmem:[%s4075_s28 + $0x194] ss:$8 sps:$4 sm:$0xff]  }
  0x71   : > { %v3952_v52 = vld [vmem:[%s4075_s28 + $0x394] ss:$8 sps:$4 sm:$0xff]  }
  0x77   : > { %1321 = vmatmul.mubr.bf16.gmra.mrb[36].mxu0 %v3858_v53  ;;  %1577 = vmatmul.mubr.bf16.gmra.mrb[36].mxu1 %v3859_v54  ;;  %v3954_v53 = vld [vmem:[%s4075_s28 + $0x190] ss:$8 sps:$4 sm:$0xff]  }
  0x78   : > { %3048 = vmatprep.mubr.msk.bf16.mxu0 %vm1016_vm0, %v3860_v55  ;;  %3080 = vmatprep.mubr.msk.bf16.mxu1 %vm1016_vm0, %v3862_v56  ;;  %v3955_v54 = vld [vmem:[%s4075_s28 + $0x390] ss:$8 sps:$4 sm:$0xff]   ;;  %v3956_v55 = vld [vmem:[%s4075_s28 + $0x1a4] ss:$8 sps:$4 sm:$0xff]  }
  0x79   : > { %v3958_v56 = vld [vmem:[%s4075_s28 + $0x3a4] ss:$8 sps:$4 sm:$0xff]  }
  0x7f   : > { %1329 = vmatmul.mubr.bf16.gmra.mrb[40].mxu0 %v3864_v57  ;;  %1585 = vmatmul.mubr.bf16.gmra.mrb[40].mxu1 %v3865_v58  ;;  %v3960_v57 = vld [vmem:[%s4075_s28 + $0x1a0] ss:$8 sps:$4 sm:$0xff]  }
  0x80   : > { %3049 = vmatprep.mubr.msk.bf16.mxu0 %vm1016_vm0, %v3866_v59  ;;  %3081 = vmatprep.mubr.msk.bf16.mxu1 %vm1016_vm0, %v3868_v60  ;;  %v3961_v58 = vld [vmem:[%s4075_s28 + $0x3a0] ss:$8 sps:$4 sm:$0xff]   ;;  %v3962_v59 = vld [vmem:[%s4075_s28 + $0x1b4] ss:$8 sps:$4 sm:$0xff]  }
  0x81   : > { %v3964_v60 = vld [vmem:[%s4075_s28 + $0x3b4] ss:$8 sps:$4 sm:$0xff]  }
  0x87   : > { %1337 = vmatmul.mubr.bf16.gmra.mrb[44].mxu0 %v3870_v61  ;;  %1593 = vmatmul.mubr.bf16.gmra.mrb[44].mxu1 %v3871_v62  ;;  %v4262_v61 = vld [vmem:[%s4506_s2] ss:$0 sm:$0xff] }
  0x88   : > { %3050 = vmatprep.mubr.msk.bf16.mxu0 %vm1016_vm0, %v3872_v63  ;;  %3082 = vmatprep.mubr.msk.bf16.mxu1 %vm1016_vm0, %v3874_v0 }
  0x8f   : > { %1345 = vmatmul.mubr.bf16.gmra.mrb[48].mxu0 %v3876_v1  ;;  %1601 = vmatmul.mubr.bf16.gmra.mrb[48].mxu1 %v3877_v2 }
  0x90   : > { %3051 = vmatprep.mubr.msk.bf16.mxu0 %vm1016_vm0, %v3878_v3  ;;  %3083 = vmatprep.mubr.msk.bf16.mxu1 %vm1016_vm0, %v3880_v4  ;;  %v3966_v4 = vld [vmem:[%s4075_s28 + $0x1b0] ss:$8 sps:$4 sm:$0xff]  }
  0x97   : > { %1353 = vmatmul.mubr.bf16.gmra.mrb[52].mxu0 %v3882_v5  ;;  %1609 = vmatmul.mubr.bf16.gmra.mrb[52].mxu1 %v3883_v6  ;;  %v3967_v5 = vld [vmem:[%s4075_s28 + $0x3b0] ss:$8 sps:$4 sm:$0xff]  }
  0x98   : > { %3052 = vmatprep.mubr.msk.bf16.mxu0 %vm1016_vm0, %v3884_v7  ;;  %3084 = vmatprep.mubr.msk.bf16.mxu1 %vm1016_vm0, %v3886_v8  ;;  %v3968_v8 = vld [vmem:[%s4075_s28 + $0x1c4] ss:$8 sps:$4 sm:$0xff]  }
  0x9f   : > { %1361 = vmatmul.mubr.bf16.gmra.mrb[56].mxu0 %v3888_v9  ;;  %1617 = vmatmul.mubr.bf16.gmra.mrb[56].mxu1 %v3889_v10  ;;  %v3970_v9 = vld [vmem:[%s4075_s28 + $0x3c4] ss:$8 sps:$4 sm:$0xff]  }
  0xa0   : > { %3053 = vmatprep.mubr.msk.bf16.mxu0 %vm1016_vm0, %v3890_v11  ;;  %3085 = vmatprep.mubr.msk.bf16.mxu1 %vm1016_vm0, %v3892_v12 }
  0xa7   : > { %1369 = vmatmul.mubr.bf16.gmra.mrb[60].mxu0 %v3894_v13  ;;  %1625 = vmatmul.mubr.bf16.gmra.mrb[60].mxu1 %v3895_v14 }
  0xa8   : > { %3054 = vmatprep.mubr.msk.bf16.mxu0 %vm1016_vm0, %v3896_v15  ;;  %3086 = vmatprep.mubr.msk.bf16.mxu1 %vm1016_vm0, %v3898_v16 }
  0xaf   : > { %1377 = vmatmul.mubr.bf16.gmra.mrb[64].mxu0 %v3900_v17  ;;  %1633 = vmatmul.mubr.bf16.gmra.mrb[64].mxu1 %v3901_v18 }
  0xb0   : > { %3055 = vmatprep.mubr.msk.bf16.mxu0 %vm1016_vm0, %v3902_v19  ;;  %3087 = vmatprep.mubr.msk.bf16.mxu1 %vm1016_vm0, %v3904_v20 }
  0xb7   : > { %1385 = vmatmul.mubr.bf16.gmra.mrb[68].mxu0 %v3906_v21  ;;  %1641 = vmatmul.mubr.bf16.gmra.mrb[68].mxu1 %v3907_v22 }
  0xb8   : > { %3056 = vmatprep.mubr.msk.bf16.mxu0 %vm1016_vm0, %v3908_v23  ;;  %3088 = vmatprep.mubr.msk.bf16.mxu1 %vm1016_vm0, %v3910_v24 }
  0xbf   : > { %1393 = vmatmul.mubr.bf16.gmra.mrb[72].mxu0 %v3912_v25  ;;  %1649 = vmatmul.mubr.bf16.gmra.mrb[72].mxu1 %v3913_v26 }
  0xc0   : > { %3057 = vmatprep.mubr.msk.bf16.mxu0 %vm1016_vm0, %v3914_v27  ;;  %3089 = vmatprep.mubr.msk.bf16.mxu1 %vm1016_vm0, %v3916_v28 }
  0xc7   : > { %1401 = vmatmul.mubr.bf16.gmra.mrb[76].mxu0 %v3918_v29  ;;  %1657 = vmatmul.mubr.bf16.gmra.mrb[76].mxu1 %v3919_v30  ;;  %v3972_v30 = vld [vmem:[%s4075_s28 + $0x1c0] ss:$8 sps:$4 sm:$0xff]  }
  0xc8   : > { %3058 = vmatprep.mubr.msk.bf16.mxu0 %vm1016_vm0, %v3920_v31  ;;  %3090 = vmatprep.mubr.msk.bf16.mxu1 %vm1016_vm0, %v3922_v32  ;;  %v3973_v31 = vld [vmem:[%s4075_s28 + $0x3c0] ss:$8 sps:$4 sm:$0xff]  }
  0xcf   : > { %1409 = vmatmul.mubr.bf16.gmra.mrb[80].mxu0 %v3924_v33  ;;  %1665 = vmatmul.mubr.bf16.gmra.mrb[80].mxu1 %v3925_v34  ;;  %v3974_v34 = vld [vmem:[%s4075_s28 + $0x1d4] ss:$8 sps:$4 sm:$0xff]  }
  0xd0   : > { %3059 = vmatprep.mubr.msk.bf16.mxu0 %vm1016_vm0, %v3926_v35  ;;  %3091 = vmatprep.mubr.msk.bf16.mxu1 %vm1016_vm0, %v3928_v36  ;;  %v3976_v35 = vld [vmem:[%s4075_s28 + $0x3d4] ss:$8 sps:$4 sm:$0xff]  }
  0xd7   : > { %1417 = vmatmul.mubr.bf16.gmra.mrb[84].mxu0 %v3930_v37  ;;  %1673 = vmatmul.mubr.bf16.gmra.mrb[84].mxu1 %v3931_v38 }
  0xd8   : > { %3060 = vmatprep.mubr.msk.bf16.mxu0 %vm1016_vm0, %v3932_v39  ;;  %3092 = vmatprep.mubr.msk.bf16.mxu1 %vm1016_vm0, %v3934_v40 }
  0xdf   : > { %1425 = vmatmul.mubr.bf16.gmra.mrb[88].mxu0 %v3936_v41  ;;  %1681 = vmatmul.mubr.bf16.gmra.mrb[88].mxu1 %v3937_v42 }
  0xe0   : > { %3061 = vmatprep.mubr.msk.bf16.mxu0 %vm1016_vm0, %v3938_v43  ;;  %3093 = vmatprep.mubr.msk.bf16.mxu1 %vm1016_vm0, %v3940_v44 }
  0xe7   : > { %1433 = vmatmul.mubr.bf16.gmra.mrb[92].mxu0 %v3942_v45  ;;  %1689 = vmatmul.mubr.bf16.gmra.mrb[92].mxu1 %v3943_v46 }
  0xe8   : > { %3062 = vmatprep.mubr.msk.bf16.mxu0 %vm1016_vm0, %v3944_v47  ;;  %3094 = vmatprep.mubr.msk.bf16.mxu1 %vm1016_vm0, %v3946_v48 }
  0xef   : > { %1441 = vmatmul.mubr.bf16.gmra.mrb[96].mxu0 %v3948_v49  ;;  %1697 = vmatmul.mubr.bf16.gmra.mrb[96].mxu1 %v3949_v50 }
  0xf0   : > { %3063 = vmatprep.mubr.msk.bf16.mxu0 %vm1016_vm0, %v3950_v51  ;;  %3095 = vmatprep.mubr.msk.bf16.mxu1 %vm1016_vm0, %v3952_v52 }
  0xf7   : > { %1449 = vmatmul.mubr.bf16.gmra.mrb[100].mxu0 %v3954_v53  ;;  %1705 = vmatmul.mubr.bf16.gmra.mrb[100].mxu1 %v3955_v54 }
  0xf8   : > { %3064 = vmatprep.mubr.msk.bf16.mxu0 %vm1016_vm0, %v3956_v55  ;;  %3096 = vmatprep.mubr.msk.bf16.mxu1 %vm1016_vm0, %v3958_v56  ;;  %v3978_v56 = vld [vmem:[%s4075_s28 + $0x1d0] ss:$8 sps:$4 sm:$0xff]  }
  0xff   : > { %1457 = vmatmul.mubr.bf16.gmra.mrb[104].mxu0 %v3960_v57  ;;  %1713 = vmatmul.mubr.bf16.gmra.mrb[104].mxu1 %v3961_v58  ;;  %v3979_v57 = vld [vmem:[%s4075_s28 + $0x3d0] ss:$8 sps:$4 sm:$0xff]  }
 0x100   : > { %3065 = vmatprep.mubr.msk.bf16.mxu0 %vm1016_vm0, %v3962_v59  ;;  %3097 = vmatprep.mubr.msk.bf16.mxu1 %vm1016_vm0, %v3964_v60  ;;  %v3980_v60 = vld [vmem:[%s4075_s28 + $0x1e4] ss:$8 sps:$4 sm:$0xff]  }
 0x102   : > { %v1250_v62 = vpop.f32.mrb[0].mxu0  ;;  %v1506_v63 = vpop.f32.mrb[0].mxu1 }
 0x103   : > { %v1251_v0 = vadd.f32 %v4262_v61, %v1250_v62  ;;  %v1507_v1 = vadd.f32 %v4262_v61, %v1506_v63  ;;  %v1252_v2 = vpop.f32.mrb[1].mxu0  ;;  %v1508_v3 = vpop.f32.mrb[1].mxu1  ;;  %v3982_v62 = vld [vmem:[%s4075_s28 + $0x3e4] ss:$8 sps:$4 sm:$0xff]  }
 0x104   : > { %v1253_v6 = vpop.f32.mrb[2].mxu0  ;;  %v1509_v7 = vpop.f32.mrb[2].mxu1 }
 0x105   : > { %v1889_v10 = vmul.f32 0.01, %v1251_v0  ;;  %v1953_v11 = vmul.f32 0.01, %v1507_v1  ;;  %v1254_v12 = vadd.f32 %v4262_v61, %v1253_v6  ;;  %v1510_v13 = vadd.f32 %v4262_v61, %v1509_v7  ;;  %v1255_v14 = vpop.f32.mrb[3].mxu0  ;;  %v1511_v15 = vpop.f32.mrb[3].mxu1 }
 0x106   : > { %vm1761_vm3 = vcmp.ge.f32.partialorder %v1251_v0, 0.0  ;;  %vm1825_vm4 = vcmp.ge.f32.partialorder %v1507_v1, 0.0 }
 0x107   : > { %1465 = vmatmul.mubr.bf16.gmra.mrb[108].mxu0 %v3966_v4  ;;  %1721 = vmatmul.mubr.bf16.gmra.mrb[108].mxu1 %v3967_v5  ;;  %vm1762_vm5 = vcmp.ge.f32.partialorder %v1254_v12, 0.0  ;;  %v1890_v16 = vmul.f32 0.01, %v1254_v12  ;;  %vm1826_vm6 = vcmp.ge.f32.partialorder %v1510_v13, 0.0  ;;  %v1954_v17 = vmul.f32 0.01, %v1510_v13 }
 0x108   : > { %3066 = vmatprep.mubr.msk.bf16.mxu0 %vm1016_vm0, %v3968_v8  ;;  %3098 = vmatprep.mubr.msk.bf16.mxu1 %vm1016_vm0, %v3970_v9  ;;  %v2017_v18 = vsel %vm1761_vm3, %v1251_v0, %v1889_v10  ;;  %v2081_v19 = vsel %vm1825_vm4, %v1507_v1, %v1953_v11 }
 0x109   : > { %v2018_v20 = vsel %vm1762_vm5, %v1254_v12, %v1890_v16  ;;  %v2082_v21 = vsel %vm1826_vm6, %v1510_v13, %v1954_v17 }
 0x10a   : > { %v1258_v22 = vpop.f32.mrb[4].mxu0  ;;  %v1514_v23 = vpop.f32.mrb[4].mxu1  ;;  %v3364_v24 = vpack.c.bf16 %v2018_v20, %v2017_v18  ;;  %v3524_v25 = vpack.c.bf16 %v2082_v21, %v2081_v19  ;;  %v3984_v19 = vld [vmem:[%s4075_s28 + $0x1e0] ss:$8 sps:$4 sm:$0xff]  }
 0x10b   : > { %v1259_v26 = vadd.f32 %v4262_v61, %v1258_v22  ;;  %v1515_v27 = vadd.f32 %v4262_v61, %v1514_v23  ;;  %v1260_v28 = vpop.f32.mrb[5].mxu0  ;;  %v1516_v29 = vpop.f32.mrb[5].mxu1  ;;  %v3985_v20 = vld [vmem:[%s4075_s28 + $0x3e0] ss:$8 sps:$4 sm:$0xff]   ;;  %v3986_v23 = vld [vmem:[%s4075_s28 + $0x1f4] ss:$8 sps:$4 sm:$0xff]  }
 0x10c   : > { %v1261_v32 = vpop.f32.mrb[6].mxu0  ;;  %v1517_v33 = vpop.f32.mrb[6].mxu1  ;;  %3365 = vst [vmem:[%s4280_s23] sm:$0xff] %v3364_v24   ;;  %3712 = vst [vmem:[%s4280_s23 + $0x100] sm:$0xff] %v3524_v25   ;;  %v3988_v24 = vld [vmem:[%s4075_s28 + $0x3f4] ss:$8 sps:$4 sm:$0xff]  }
 0x10d   : > { %v1891_v36 = vmul.f32 0.01, %v1259_v26  ;;  %v1955_v37 = vmul.f32 0.01, %v1515_v27  ;;  %v1262_v38 = vadd.f32 %v4262_v61, %v1261_v32  ;;  %v1518_v39 = vadd.f32 %v4262_v61, %v1517_v33  ;;  %v1263_v40 = vpop.f32.mrb[7].mxu0  ;;  %v1519_v41 = vpop.f32.mrb[7].mxu1 }
 0x10e   : > { %vm1763_vm7 = vcmp.ge.f32.partialorder %v1259_v26, 0.0  ;;  %vm1827_vm8 = vcmp.ge.f32.partialorder %v1515_v27, 0.0 }
 0x10f   : > { %1473 = vmatmul.mubr.bf16.gmra.mrb[112].mxu0 %v3972_v30  ;;  %1729 = vmatmul.mubr.bf16.gmra.mrb[112].mxu1 %v3973_v31  ;;  %vm1764_vm9 = vcmp.ge.f32.partialorder %v1262_v38, 0.0  ;;  %v1892_v42 = vmul.f32 0.01, %v1262_v38  ;;  %vm1828_vm10 = vcmp.ge.f32.partialorder %v1518_v39, 0.0  ;;  %v1956_v43 = vmul.f32 0.01, %v1518_v39 }
 0x110   : > { %3067 = vmatprep.mubr.msk.bf16.mxu0 %vm1016_vm0, %v3974_v34  ;;  %3099 = vmatprep.mubr.msk.bf16.mxu1 %vm1016_vm0, %v3976_v35  ;;  %v2019_v44 = vsel %vm1763_vm7, %v1259_v26, %v1891_v36  ;;  %v2083_v45 = vsel %vm1827_vm8, %v1515_v27, %v1955_v37 }
 0x111   : > { %v2020_v46 = vsel %vm1764_vm9, %v1262_v38, %v1892_v42  ;;  %v2084_v47 = vsel %vm1828_vm10, %v1518_v39, %v1956_v43 }
 0x112   : > { %v1266_v48 = vpop.f32.mrb[8].mxu0  ;;  %v1522_v49 = vpop.f32.mrb[8].mxu1  ;;  %v3369_v50 = vpack.c.bf16 %v2020_v46, %v2019_v44  ;;  %v3529_v51 = vpack.c.bf16 %v2084_v47, %v2083_v45  ;;  %v3990_v45 = vld [vmem:[%s4075_s28 + $0x1f0] ss:$8 sps:$4 sm:$0xff]  }
 0x113   : > { %v1267_v52 = vadd.f32 %v4262_v61, %v1266_v48  ;;  %v1523_v53 = vadd.f32 %v4262_v61, %v1522_v49  ;;  %v1268_v54 = vpop.f32.mrb[9].mxu0  ;;  %v1524_v55 = vpop.f32.mrb[9].mxu1  ;;  %v3991_v46 = vld [vmem:[%s4075_s28 + $0x3f0] ss:$8 sps:$4 sm:$0xff]  }
 0x114   : > { %v1269_v58 = vpop.f32.mrb[10].mxu0  ;;  %v1525_v59 = vpop.f32.mrb[10].mxu1  ;;  %3681 = vst [vmem:[%s4280_s23 + $0x8] sm:$0xff] %v3369_v50   ;;  %3713 = vst [vmem:[%s4280_s23 + $0x108] sm:$0xff] %v3529_v51  }
 0x115   : > { %v1893_v63 = vmul.f32 0.01, %v1267_v52  ;;  %v1957_v0 = vmul.f32 0.01, %v1523_v53  ;;  %v1270_v1 = vadd.f32 %v4262_v61, %v1269_v58  ;;  %v1526_v2 = vadd.f32 %v4262_v61, %v1525_v59  ;;  %v1271_v3 = vpop.f32.mrb[11].mxu0  ;;  %v1527_v4 = vpop.f32.mrb[11].mxu1 }
 0x116   : > { %vm1765_vm11 = vcmp.ge.f32.partialorder %v1267_v52, 0.0  ;;  %vm1829_vm12 = vcmp.ge.f32.partialorder %v1523_v53, 0.0 }
 0x117   : > { %1481 = vmatmul.mubr.bf16.gmra.mrb[116].mxu0 %v3978_v56  ;;  %1737 = vmatmul.mubr.bf16.gmra.mrb[116].mxu1 %v3979_v57  ;;  %vm1766_vm13 = vcmp.ge.f32.partialorder %v1270_v1, 0.0  ;;  %v1894_v5 = vmul.f32 0.01, %v1270_v1  ;;  %vm1830_vm14 = vcmp.ge.f32.partialorder %v1526_v2, 0.0  ;;  %v1958_v6 = vmul.f32 0.01, %v1526_v2 }
 0x118   : > { %3068 = vmatprep.mubr.msk.bf16.mxu0 %vm1016_vm0, %v3980_v60  ;;  %3100 = vmatprep.mubr.msk.bf16.mxu1 %vm1016_vm0, %v3982_v62  ;;  %v2021_v7 = vsel %vm1765_vm11, %v1267_v52, %v1893_v63  ;;  %v2085_v8 = vsel %vm1829_vm12, %v1523_v53, %v1957_v0 }
 0x119   : > { %v2022_v9 = vsel %vm1766_vm13, %v1270_v1, %v1894_v5  ;;  %v2086_v10 = vsel %vm1830_vm14, %v1526_v2, %v1958_v6 }
 0x11a   : > { %v1274_v11 = vpop.f32.mrb[12].mxu0  ;;  %v1530_v12 = vpop.f32.mrb[12].mxu1  ;;  %v3374_v13 = vpack.c.bf16 %v2022_v9, %v2021_v7  ;;  %v3534_v14 = vpack.c.bf16 %v2086_v10, %v2085_v8 }
 0x11b   : > { %v1275_v15 = vadd.f32 %v4262_v61, %v1274_v11  ;;  %v1531_v16 = vadd.f32 %v4262_v61, %v1530_v12  ;;  %v1276_v17 = vpop.f32.mrb[13].mxu0  ;;  %v1532_v18 = vpop.f32.mrb[13].mxu1 }
 0x11c   : > { %v1277_v21 = vpop.f32.mrb[14].mxu0  ;;  %v1533_v22 = vpop.f32.mrb[14].mxu1  ;;  %3682 = vst [vmem:[%s4280_s23 + $0x10] sm:$0xff] %v3374_v13   ;;  %3714 = vst [vmem:[%s4280_s23 + $0x110] sm:$0xff] %v3534_v14  }
 0x11d   : > { %v1895_v25 = vmul.f32 0.01, %v1275_v15  ;;  %v1959_v26 = vmul.f32 0.01, %v1531_v16  ;;  %v1278_v27 = vadd.f32 %v4262_v61, %v1277_v21  ;;  %v1534_v28 = vadd.f32 %v4262_v61, %v1533_v22  ;;  %v1279_v29 = vpop.f32.mrb[15].mxu0  ;;  %v1535_v30 = vpop.f32.mrb[15].mxu1 }
 0x11e   : > { %vm1767_vm15 = vcmp.ge.f32.partialorder %v1275_v15, 0.0  ;;  %vm1831_vm1 = vcmp.ge.f32.partialorder %v1531_v16, 0.0 }
 0x11f   : > { %1489 = vmatmul.mubr.bf16.gmra.mrb[120].mxu0 %v3984_v19  ;;  %1745 = vmatmul.mubr.bf16.gmra.mrb[120].mxu1 %v3985_v20  ;;  %vm1768_vm2 = vcmp.ge.f32.partialorder %v1278_v27, 0.0  ;;  %v1896_v31 = vmul.f32 0.01, %v1278_v27  ;;  %vm1832_vm3 = vcmp.ge.f32.partialorder %v1534_v28, 0.0  ;;  %v1960_v32 = vmul.f32 0.01, %v1534_v28 }
 0x120   : > { %3069 = vmatprep.mubr.msk.bf16.mxu0 %vm1016_vm0, %v3986_v23  ;;  %3101 = vmatprep.mubr.msk.bf16.mxu1 %vm1016_vm0, %v3988_v24  ;;  %v2023_v33 = vsel %vm1767_vm15, %v1275_v15, %v1895_v25  ;;  %v2087_v34 = vsel %vm1831_vm1, %v1531_v16, %v1959_v26 }
 0x121   : > { %v2024_v35 = vsel %vm1768_vm2, %v1278_v27, %v1896_v31  ;;  %v2088_v36 = vsel %vm1832_vm3, %v1534_v28, %v1960_v32 }
 0x122   : > { %v1282_v37 = vpop.f32.mrb[16].mxu0  ;;  %v1538_v38 = vpop.f32.mrb[16].mxu1  ;;  %v3379_v39 = vpack.c.bf16 %v2024_v35, %v2023_v33  ;;  %v3539_v40 = vpack.c.bf16 %v2088_v36, %v2087_v34 }
 0x123   : > { %v1283_v41 = vadd.f32 %v4262_v61, %v1282_v37  ;;  %v1539_v42 = vadd.f32 %v4262_v61, %v1538_v38  ;;  %v1284_v43 = vpop.f32.mrb[17].mxu0  ;;  %v1540_v44 = vpop.f32.mrb[17].mxu1 }
 0x124   : > { %v1285_v47 = vpop.f32.mrb[18].mxu0  ;;  %v1541_v48 = vpop.f32.mrb[18].mxu1  ;;  %3683 = vst [vmem:[%s4280_s23 + $0x18] sm:$0xff] %v3379_v39   ;;  %3715 = vst [vmem:[%s4280_s23 + $0x118] sm:$0xff] %v3539_v40  }
 0x125   : > { %v1897_v49 = vmul.f32 0.01, %v1283_v41  ;;  %v1961_v50 = vmul.f32 0.01, %v1539_v42  ;;  %v1286_v51 = vadd.f32 %v4262_v61, %v1285_v47  ;;  %v1542_v52 = vadd.f32 %v4262_v61, %v1541_v48  ;;  %v1287_v53 = vpop.f32.mrb[19].mxu0  ;;  %v1543_v54 = vpop.f32.mrb[19].mxu1 }
 0x126   : > { %vm1769_vm0 = vcmp.ge.f32.partialorder %v1283_v41, 0.0  ;;  %vm1833_vm4 = vcmp.ge.f32.partialorder %v1539_v42, 0.0 }
 0x127   : > { %1497 = vmatmul.mubr.bf16.gmra.mrb[124].mxu0 %v3990_v45  ;;  %1753 = vmatmul.mubr.bf16.gmra.mrb[124].mxu1 %v3991_v46  ;;  %vm1770_vm5 = vcmp.ge.f32.partialorder %v1286_v51, 0.0  ;;  %v1898_v55 = vmul.f32 0.01, %v1286_v51  ;;  %vm1834_vm6 = vcmp.ge.f32.partialorder %v1542_v52, 0.0  ;;  %v1962_v56 = vmul.f32 0.01, %v1542_v52 }
 0x128   : > { %v2025_v57 = vsel %vm1769_vm0, %v1283_v41, %v1897_v49  ;;  %v2089_v58 = vsel %vm1833_vm4, %v1539_v42, %v1961_v50 }
 0x129   : > { %v2026_v59 = vsel %vm1770_vm5, %v1286_v51, %v1898_v55  ;;  %v2090_v60 = vsel %vm1834_vm6, %v1542_v52, %v1962_v56 }
 0x12a   : > { %v1290_v62 = vpop.f32.mrb[20].mxu0  ;;  %v1546_v63 = vpop.f32.mrb[20].mxu1  ;;  %v3384_v0 = vpack.c.bf16 %v2026_v59, %v2025_v57  ;;  %v3544_v1 = vpack.c.bf16 %v2090_v60, %v2089_v58 }
 0x12b   : > { %v1291_v2 = vadd.f32 %v4262_v61, %v1290_v62  ;;  %v1547_v3 = vadd.f32 %v4262_v61, %v1546_v63  ;;  %v1292_v4 = vpop.f32.mrb[21].mxu0  ;;  %v1548_v5 = vpop.f32.mrb[21].mxu1 }
 0x12c   : > { %v1293_v6 = vpop.f32.mrb[22].mxu0  ;;  %v1549_v7 = vpop.f32.mrb[22].mxu1  ;;  %3684 = vst [vmem:[%s4280_s23 + $0x20] sm:$0xff] %v3384_v0   ;;  %3716 = vst [vmem:[%s4280_s23 + $0x120] sm:$0xff] %v3544_v1  }
 0x12d   : > { %v1899_v8 = vmul.f32 0.01, %v1291_v2  ;;  %v1963_v9 = vmul.f32 0.01, %v1547_v3  ;;  %v1294_v10 = vadd.f32 %v4262_v61, %v1293_v6  ;;  %v1550_v11 = vadd.f32 %v4262_v61, %v1549_v7  ;;  %v1295_v12 = vpop.f32.mrb[23].mxu0  ;;  %v1551_v13 = vpop.f32.mrb[23].mxu1 }
 0x12e   : > { %vm1771_vm7 = vcmp.ge.f32.partialorder %v1291_v2, 0.0  ;;  %vm1835_vm8 = vcmp.ge.f32.partialorder %v1547_v3, 0.0 }
 0x12f   : > { %vm1772_vm9 = vcmp.ge.f32.partialorder %v1294_v10, 0.0  ;;  %v1900_v14 = vmul.f32 0.01, %v1294_v10  ;;  %vm1836_vm10 = vcmp.ge.f32.partialorder %v1550_v11, 0.0  ;;  %v1964_v15 = vmul.f32 0.01, %v1550_v11 }
 0x130   : > { %v2027_v16 = vsel %vm1771_vm7, %v1291_v2, %v1899_v8  ;;  %v2091_v17 = vsel %vm1835_vm8, %v1547_v3, %v1963_v9 }
 0x131   : > { %v2028_v18 = vsel %vm1772_vm9, %v1294_v10, %v1900_v14  ;;  %v2092_v19 = vsel %vm1836_vm10, %v1550_v11, %v1964_v15 }
 0x132   : > { %v1298_v20 = vpop.f32.mrb[24].mxu0  ;;  %v1554_v21 = vpop.f32.mrb[24].mxu1  ;;  %v3389_v22 = vpack.c.bf16 %v2028_v18, %v2027_v16  ;;  %v3549_v23 = vpack.c.bf16 %v2092_v19, %v2091_v17 }
 0x133   : > { %v1299_v24 = vadd.f32 %v4262_v61, %v1298_v20  ;;  %v1555_v25 = vadd.f32 %v4262_v61, %v1554_v21  ;;  %v1300_v26 = vpop.f32.mrb[25].mxu0  ;;  %v1556_v27 = vpop.f32.mrb[25].mxu1 }
 0x134   : > { %v1301_v28 = vpop.f32.mrb[26].mxu0  ;;  %v1557_v29 = vpop.f32.mrb[26].mxu1  ;;  %3685 = vst [vmem:[%s4280_s23 + $0x28] sm:$0xff] %v3389_v22   ;;  %3717 = vst [vmem:[%s4280_s23 + $0x128] sm:$0xff] %v3549_v23  }
 0x135   : > { %v1901_v30 = vmul.f32 0.01, %v1299_v24  ;;  %v1965_v31 = vmul.f32 0.01, %v1555_v25  ;;  %v1302_v32 = vadd.f32 %v4262_v61, %v1301_v28  ;;  %v1558_v33 = vadd.f32 %v4262_v61, %v1557_v29  ;;  %v1303_v34 = vpop.f32.mrb[27].mxu0  ;;  %v1559_v35 = vpop.f32.mrb[27].mxu1 }
 0x136   : > { %vm1773_vm11 = vcmp.ge.f32.partialorder %v1299_v24, 0.0  ;;  %vm1837_vm12 = vcmp.ge.f32.partialorder %v1555_v25, 0.0 }
 0x137   : > { %vm1774_vm13 = vcmp.ge.f32.partialorder %v1302_v32, 0.0  ;;  %v1902_v36 = vmul.f32 0.01, %v1302_v32  ;;  %vm1838_vm14 = vcmp.ge.f32.partialorder %v1558_v33, 0.0  ;;  %v1966_v37 = vmul.f32 0.01, %v1558_v33 }
 0x138   : > { %v2029_v38 = vsel %vm1773_vm11, %v1299_v24, %v1901_v30  ;;  %v2093_v39 = vsel %vm1837_vm12, %v1555_v25, %v1965_v31 }
 0x139   : > { %v2030_v40 = vsel %vm1774_vm13, %v1302_v32, %v1902_v36  ;;  %v2094_v41 = vsel %vm1838_vm14, %v1558_v33, %v1966_v37 }
 0x13a   : > { %v1306_v42 = vpop.f32.mrb[28].mxu0  ;;  %v1562_v43 = vpop.f32.mrb[28].mxu1  ;;  %v3394_v44 = vpack.c.bf16 %v2030_v40, %v2029_v38  ;;  %v3554_v45 = vpack.c.bf16 %v2094_v41, %v2093_v39 }
 0x13b   : > { %v1307_v46 = vadd.f32 %v4262_v61, %v1306_v42  ;;  %v1563_v47 = vadd.f32 %v4262_v61, %v1562_v43  ;;  %v1308_v48 = vpop.f32.mrb[29].mxu0  ;;  %v1564_v49 = vpop.f32.mrb[29].mxu1 }
 0x13c   : > { %v1309_v50 = vpop.f32.mrb[30].mxu0  ;;  %v1565_v51 = vpop.f32.mrb[30].mxu1  ;;  %3686 = vst [vmem:[%s4280_s23 + $0x30] sm:$0xff] %v3394_v44   ;;  %3718 = vst [vmem:[%s4280_s23 + $0x130] sm:$0xff] %v3554_v45  }
 0x13d   : > { %v1903_v52 = vmul.f32 0.01, %v1307_v46  ;;  %v1967_v53 = vmul.f32 0.01, %v1563_v47  ;;  %v1310_v54 = vadd.f32 %v4262_v61, %v1309_v50  ;;  %v1566_v55 = vadd.f32 %v4262_v61, %v1565_v51  ;;  %v1311_v56 = vpop.f32.mrb[31].mxu0  ;;  %v1567_v57 = vpop.f32.mrb[31].mxu1 }
 0x13e   : > { %vm1775_vm15 = vcmp.ge.f32.partialorder %v1307_v46, 0.0  ;;  %vm1839_vm1 = vcmp.ge.f32.partialorder %v1563_v47, 0.0 }
 0x13f   : > { %vm1776_vm2 = vcmp.ge.f32.partialorder %v1310_v54, 0.0  ;;  %v1904_v58 = vmul.f32 0.01, %v1310_v54  ;;  %vm1840_vm3 = vcmp.ge.f32.partialorder %v1566_v55, 0.0  ;;  %v1968_v59 = vmul.f32 0.01, %v1566_v55 }
 0x140   : > { %v2031_v60 = vsel %vm1775_vm15, %v1307_v46, %v1903_v52  ;;  %v2095_v62 = vsel %vm1839_vm1, %v1563_v47, %v1967_v53 }
 0x141   : > { %v2032_v63 = vsel %vm1776_vm2, %v1310_v54, %v1904_v58  ;;  %v2096_v0 = vsel %vm1840_vm3, %v1566_v55, %v1968_v59 }
 0x142   : > { %v1314_v1 = vpop.f32.mrb[32].mxu0  ;;  %v1570_v2 = vpop.f32.mrb[32].mxu1  ;;  %v3399_v3 = vpack.c.bf16 %v2032_v63, %v2031_v60  ;;  %v3559_v4 = vpack.c.bf16 %v2096_v0, %v2095_v62 }
 0x143   : > { %v1315_v5 = vadd.f32 %v4262_v61, %v1314_v1  ;;  %v1571_v6 = vadd.f32 %v4262_v61, %v1570_v2  ;;  %v1316_v7 = vpop.f32.mrb[33].mxu0  ;;  %v1572_v8 = vpop.f32.mrb[33].mxu1 }
 0x144   : > { %v1317_v9 = vpop.f32.mrb[34].mxu0  ;;  %v1573_v10 = vpop.f32.mrb[34].mxu1  ;;  %3687 = vst [vmem:[%s4280_s23 + $0x38] sm:$0xff] %v3399_v3   ;;  %3719 = vst [vmem:[%s4280_s23 + $0x138] sm:$0xff] %v3559_v4  }
 0x145   : > { %v1905_v11 = vmul.f32 0.01, %v1315_v5  ;;  %v1969_v12 = vmul.f32 0.01, %v1571_v6  ;;  %v1318_v13 = vadd.f32 %v4262_v61, %v1317_v9  ;;  %v1574_v14 = vadd.f32 %v4262_v61, %v1573_v10  ;;  %v1319_v15 = vpop.f32.mrb[35].mxu0  ;;  %v1575_v16 = vpop.f32.mrb[35].mxu1 }
 0x146   : > { %vm1777_vm0 = vcmp.ge.f32.partialorder %v1315_v5, 0.0  ;;  %vm1841_vm4 = vcmp.ge.f32.partialorder %v1571_v6, 0.0 }
 0x147   : > { %vm1778_vm5 = vcmp.ge.f32.partialorder %v1318_v13, 0.0  ;;  %v1906_v17 = vmul.f32 0.01, %v1318_v13  ;;  %vm1842_vm6 = vcmp.ge.f32.partialorder %v1574_v14, 0.0  ;;  %v1970_v18 = vmul.f32 0.01, %v1574_v14 }
 0x148   : > { %v2033_v19 = vsel %vm1777_vm0, %v1315_v5, %v1905_v11  ;;  %v2097_v20 = vsel %vm1841_vm4, %v1571_v6, %v1969_v12 }
 0x149   : > { %v2034_v21 = vsel %vm1778_vm5, %v1318_v13, %v1906_v17  ;;  %v2098_v22 = vsel %vm1842_vm6, %v1574_v14, %v1970_v18 }
 0x14a   : > { %v1322_v23 = vpop.f32.mrb[36].mxu0  ;;  %v1578_v24 = vpop.f32.mrb[36].mxu1  ;;  %v3404_v25 = vpack.c.bf16 %v2034_v21, %v2033_v19  ;;  %v3564_v26 = vpack.c.bf16 %v2098_v22, %v2097_v20 }
 0x14b   : > { %v1323_v27 = vadd.f32 %v4262_v61, %v1322_v23  ;;  %v1579_v28 = vadd.f32 %v4262_v61, %v1578_v24  ;;  %v1324_v29 = vpop.f32.mrb[37].mxu0  ;;  %v1580_v30 = vpop.f32.mrb[37].mxu1 }
 0x14c   : > { %v1325_v31 = vpop.f32.mrb[38].mxu0  ;;  %v1581_v32 = vpop.f32.mrb[38].mxu1  ;;  %3688 = vst [vmem:[%s4280_s23 + $0x40] sm:$0xff] %v3404_v25   ;;  %3720 = vst [vmem:[%s4280_s23 + $0x140] sm:$0xff] %v3564_v26  }
 0x14d   : > { %v1907_v33 = vmul.f32 0.01, %v1323_v27  ;;  %v1971_v34 = vmul.f32 0.01, %v1579_v28  ;;  %v1326_v35 = vadd.f32 %v4262_v61, %v1325_v31  ;;  %v1582_v36 = vadd.f32 %v4262_v61, %v1581_v32  ;;  %v1327_v37 = vpop.f32.mrb[39].mxu0  ;;  %v1583_v38 = vpop.f32.mrb[39].mxu1 }
 0x14e   : > { %vm1779_vm7 = vcmp.ge.f32.partialorder %v1323_v27, 0.0  ;;  %vm1843_vm8 = vcmp.ge.f32.partialorder %v1579_v28, 0.0 }
 0x14f   : > { %vm1780_vm9 = vcmp.ge.f32.partialorder %v1326_v35, 0.0  ;;  %v1908_v39 = vmul.f32 0.01, %v1326_v35  ;;  %vm1844_vm10 = vcmp.ge.f32.partialorder %v1582_v36, 0.0  ;;  %v1972_v40 = vmul.f32 0.01, %v1582_v36 }
 0x150   : > { %v2035_v41 = vsel %vm1779_vm7, %v1323_v27, %v1907_v33  ;;  %v2099_v42 = vsel %vm1843_vm8, %v1579_v28, %v1971_v34 }
 0x151   : > { %v2036_v43 = vsel %vm1780_vm9, %v1326_v35, %v1908_v39  ;;  %v2100_v44 = vsel %vm1844_vm10, %v1582_v36, %v1972_v40 }
 0x152   : > { %v1330_v45 = vpop.f32.mrb[40].mxu0  ;;  %v1586_v46 = vpop.f32.mrb[40].mxu1  ;;  %v3409_v47 = vpack.c.bf16 %v2036_v43, %v2035_v41  ;;  %v3569_v48 = vpack.c.bf16 %v2100_v44, %v2099_v42 }
 0x153   : > { %v1331_v49 = vadd.f32 %v4262_v61, %v1330_v45  ;;  %v1587_v50 = vadd.f32 %v4262_v61, %v1586_v46  ;;  %v1332_v51 = vpop.f32.mrb[41].mxu0  ;;  %v1588_v52 = vpop.f32.mrb[41].mxu1 }
 0x154   : > { %v1333_v53 = vpop.f32.mrb[42].mxu0  ;;  %v1589_v54 = vpop.f32.mrb[42].mxu1  ;;  %3689 = vst [vmem:[%s4280_s23 + $0x48] sm:$0xff] %v3409_v47   ;;  %3721 = vst [vmem:[%s4280_s23 + $0x148] sm:$0xff] %v3569_v48  }
 0x155   : > { %v1909_v55 = vmul.f32 0.01, %v1331_v49  ;;  %v1973_v56 = vmul.f32 0.01, %v1587_v50  ;;  %v1334_v57 = vadd.f32 %v4262_v61, %v1333_v53  ;;  %v1590_v58 = vadd.f32 %v4262_v61, %v1589_v54  ;;  %v1335_v59 = vpop.f32.mrb[43].mxu0  ;;  %v1591_v60 = vpop.f32.mrb[43].mxu1 }
 0x156   : > { %vm1781_vm11 = vcmp.ge.f32.partialorder %v1331_v49, 0.0  ;;  %vm1845_vm12 = vcmp.ge.f32.partialorder %v1587_v50, 0.0 }
 0x157   : > { %vm1782_vm13 = vcmp.ge.f32.partialorder %v1334_v57, 0.0  ;;  %v1910_v62 = vmul.f32 0.01, %v1334_v57  ;;  %vm1846_vm14 = vcmp.ge.f32.partialorder %v1590_v58, 0.0  ;;  %v1974_v63 = vmul.f32 0.01, %v1590_v58 }
 0x158   : > { %v2037_v0 = vsel %vm1781_vm11, %v1331_v49, %v1909_v55  ;;  %v2101_v1 = vsel %vm1845_vm12, %v1587_v50, %v1973_v56 }
 0x159   : > { %v2038_v2 = vsel %vm1782_vm13, %v1334_v57, %v1910_v62  ;;  %v2102_v3 = vsel %vm1846_vm14, %v1590_v58, %v1974_v63 }
 0x15a   : > { %v1338_v4 = vpop.f32.mrb[44].mxu0  ;;  %v1594_v5 = vpop.f32.mrb[44].mxu1  ;;  %v3414_v6 = vpack.c.bf16 %v2038_v2, %v2037_v0  ;;  %v3574_v7 = vpack.c.bf16 %v2102_v3, %v2101_v1 }
 0x15b   : > { %v1339_v8 = vadd.f32 %v4262_v61, %v1338_v4  ;;  %v1595_v9 = vadd.f32 %v4262_v61, %v1594_v5  ;;  %v1340_v10 = vpop.f32.mrb[45].mxu0  ;;  %v1596_v11 = vpop.f32.mrb[45].mxu1 }
 0x15c   : > { %v1341_v12 = vpop.f32.mrb[46].mxu0  ;;  %v1597_v13 = vpop.f32.mrb[46].mxu1  ;;  %3690 = vst [vmem:[%s4280_s23 + $0x50] sm:$0xff] %v3414_v6   ;;  %3722 = vst [vmem:[%s4280_s23 + $0x150] sm:$0xff] %v3574_v7  }
 0x15d   : > { %v1911_v14 = vmul.f32 0.01, %v1339_v8  ;;  %v1975_v15 = vmul.f32 0.01, %v1595_v9  ;;  %v1342_v16 = vadd.f32 %v4262_v61, %v1341_v12  ;;  %v1598_v17 = vadd.f32 %v4262_v61, %v1597_v13  ;;  %v1343_v18 = vpop.f32.mrb[47].mxu0  ;;  %v1599_v19 = vpop.f32.mrb[47].mxu1 }
 0x15e   : > { %vm1783_vm15 = vcmp.ge.f32.partialorder %v1339_v8, 0.0  ;;  %vm1847_vm1 = vcmp.ge.f32.partialorder %v1595_v9, 0.0 }
 0x15f   : > { %vm1784_vm2 = vcmp.ge.f32.partialorder %v1342_v16, 0.0  ;;  %v1912_v20 = vmul.f32 0.01, %v1342_v16  ;;  %vm1848_vm3 = vcmp.ge.f32.partialorder %v1598_v17, 0.0  ;;  %v1976_v21 = vmul.f32 0.01, %v1598_v17 }
 0x160   : > { %v2039_v22 = vsel %vm1783_vm15, %v1339_v8, %v1911_v14  ;;  %v2103_v23 = vsel %vm1847_vm1, %v1595_v9, %v1975_v15 }
 0x161   : > { %v2040_v24 = vsel %vm1784_vm2, %v1342_v16, %v1912_v20  ;;  %v2104_v25 = vsel %vm1848_vm3, %v1598_v17, %v1976_v21 }
 0x162   : > { %v1346_v26 = vpop.f32.mrb[48].mxu0  ;;  %v1602_v27 = vpop.f32.mrb[48].mxu1  ;;  %v3419_v28 = vpack.c.bf16 %v2040_v24, %v2039_v22  ;;  %v3579_v29 = vpack.c.bf16 %v2104_v25, %v2103_v23 }
 0x163   : > { %v1347_v30 = vadd.f32 %v4262_v61, %v1346_v26  ;;  %v1603_v31 = vadd.f32 %v4262_v61, %v1602_v27  ;;  %v1348_v32 = vpop.f32.mrb[49].mxu0  ;;  %v1604_v33 = vpop.f32.mrb[49].mxu1 }
 0x164   : > { %v1349_v34 = vpop.f32.mrb[50].mxu0  ;;  %v1605_v35 = vpop.f32.mrb[50].mxu1  ;;  %3691 = vst [vmem:[%s4280_s23 + $0x58] sm:$0xff] %v3419_v28   ;;  %3723 = vst [vmem:[%s4280_s23 + $0x158] sm:$0xff] %v3579_v29  }
 0x165   : > { %v1913_v36 = vmul.f32 0.01, %v1347_v30  ;;  %v1977_v37 = vmul.f32 0.01, %v1603_v31  ;;  %v1350_v38 = vadd.f32 %v4262_v61, %v1349_v34  ;;  %v1606_v39 = vadd.f32 %v4262_v61, %v1605_v35  ;;  %v1351_v40 = vpop.f32.mrb[51].mxu0  ;;  %v1607_v41 = vpop.f32.mrb[51].mxu1 }
 0x166   : > { %vm1785_vm0 = vcmp.ge.f32.partialorder %v1347_v30, 0.0  ;;  %vm1849_vm4 = vcmp.ge.f32.partialorder %v1603_v31, 0.0 }
 0x167   : > { %vm1786_vm5 = vcmp.ge.f32.partialorder %v1350_v38, 0.0  ;;  %v1914_v42 = vmul.f32 0.01, %v1350_v38  ;;  %vm1850_vm6 = vcmp.ge.f32.partialorder %v1606_v39, 0.0  ;;  %v1978_v43 = vmul.f32 0.01, %v1606_v39 }
 0x168   : > { %v2041_v44 = vsel %vm1785_vm0, %v1347_v30, %v1913_v36  ;;  %v2105_v45 = vsel %vm1849_vm4, %v1603_v31, %v1977_v37 }
 0x169   : > { %v2042_v46 = vsel %vm1786_vm5, %v1350_v38, %v1914_v42  ;;  %v2106_v47 = vsel %vm1850_vm6, %v1606_v39, %v1978_v43 }
 0x16a   : > { %v1354_v48 = vpop.f32.mrb[52].mxu0  ;;  %v1610_v49 = vpop.f32.mrb[52].mxu1  ;;  %v3424_v50 = vpack.c.bf16 %v2042_v46, %v2041_v44  ;;  %v3584_v51 = vpack.c.bf16 %v2106_v47, %v2105_v45 }
 0x16b   : > { %v1355_v52 = vadd.f32 %v4262_v61, %v1354_v48  ;;  %v1611_v53 = vadd.f32 %v4262_v61, %v1610_v49  ;;  %v1356_v54 = vpop.f32.mrb[53].mxu0  ;;  %v1612_v55 = vpop.f32.mrb[53].mxu1 }
 0x16c   : > { %v1357_v56 = vpop.f32.mrb[54].mxu0  ;;  %v1613_v57 = vpop.f32.mrb[54].mxu1  ;;  %3692 = vst [vmem:[%s4280_s23 + $0x60] sm:$0xff] %v3424_v50   ;;  %3724 = vst [vmem:[%s4280_s23 + $0x160] sm:$0xff] %v3584_v51  }
 0x16d   : > { %v1915_v58 = vmul.f32 0.01, %v1355_v52  ;;  %v1979_v59 = vmul.f32 0.01, %v1611_v53  ;;  %v1358_v60 = vadd.f32 %v4262_v61, %v1357_v56  ;;  %v1614_v62 = vadd.f32 %v4262_v61, %v1613_v57  ;;  %v1359_v63 = vpop.f32.mrb[55].mxu0  ;;  %v1615_v0 = vpop.f32.mrb[55].mxu1 }
 0x16e   : > { %vm1787_vm7 = vcmp.ge.f32.partialorder %v1355_v52, 0.0  ;;  %vm1851_vm8 = vcmp.ge.f32.partialorder %v1611_v53, 0.0 }
 0x16f   : > { %vm1788_vm9 = vcmp.ge.f32.partialorder %v1358_v60, 0.0  ;;  %v1916_v1 = vmul.f32 0.01, %v1358_v60  ;;  %vm1852_vm10 = vcmp.ge.f32.partialorder %v1614_v62, 0.0  ;;  %v1980_v2 = vmul.f32 0.01, %v1614_v62 }
 0x170   : > { %v2043_v3 = vsel %vm1787_vm7, %v1355_v52, %v1915_v58  ;;  %v2107_v4 = vsel %vm1851_vm8, %v1611_v53, %v1979_v59 }
 0x171   : > { %v2044_v5 = vsel %vm1788_vm9, %v1358_v60, %v1916_v1  ;;  %v2108_v6 = vsel %vm1852_vm10, %v1614_v62, %v1980_v2 }
 0x172   : > { %v1362_v7 = vpop.f32.mrb[56].mxu0  ;;  %v1618_v8 = vpop.f32.mrb[56].mxu1  ;;  %v3429_v9 = vpack.c.bf16 %v2044_v5, %v2043_v3  ;;  %v3589_v10 = vpack.c.bf16 %v2108_v6, %v2107_v4 }
 0x173   : > { %v1363_v11 = vadd.f32 %v4262_v61, %v1362_v7  ;;  %v1619_v12 = vadd.f32 %v4262_v61, %v1618_v8  ;;  %v1364_v13 = vpop.f32.mrb[57].mxu0  ;;  %v1620_v14 = vpop.f32.mrb[57].mxu1 }
 0x174   : > { %v1365_v15 = vpop.f32.mrb[58].mxu0  ;;  %v1621_v16 = vpop.f32.mrb[58].mxu1  ;;  %3693 = vst [vmem:[%s4280_s23 + $0x68] sm:$0xff] %v3429_v9   ;;  %3725 = vst [vmem:[%s4280_s23 + $0x168] sm:$0xff] %v3589_v10  }
 0x175   : > { %v1917_v17 = vmul.f32 0.01, %v1363_v11  ;;  %v1981_v18 = vmul.f32 0.01, %v1619_v12  ;;  %v1366_v19 = vadd.f32 %v4262_v61, %v1365_v15  ;;  %v1622_v20 = vadd.f32 %v4262_v61, %v1621_v16  ;;  %v1367_v21 = vpop.f32.mrb[59].mxu0  ;;  %v1623_v22 = vpop.f32.mrb[59].mxu1 }
 0x176   : > { %vm1789_vm11 = vcmp.ge.f32.partialorder %v1363_v11, 0.0  ;;  %vm1853_vm12 = vcmp.ge.f32.partialorder %v1619_v12, 0.0 }
 0x177   : > { %vm1790_vm13 = vcmp.ge.f32.partialorder %v1366_v19, 0.0  ;;  %v1918_v23 = vmul.f32 0.01, %v1366_v19  ;;  %vm1854_vm14 = vcmp.ge.f32.partialorder %v1622_v20, 0.0  ;;  %v1982_v24 = vmul.f32 0.01, %v1622_v20 }
 0x178   : > { %v2045_v25 = vsel %vm1789_vm11, %v1363_v11, %v1917_v17  ;;  %v2109_v26 = vsel %vm1853_vm12, %v1619_v12, %v1981_v18 }
 0x179   : > { %v2046_v27 = vsel %vm1790_vm13, %v1366_v19, %v1918_v23  ;;  %v2110_v28 = vsel %vm1854_vm14, %v1622_v20, %v1982_v24 }
 0x17a   : > { %v1370_v29 = vpop.f32.mrb[60].mxu0  ;;  %v1626_v30 = vpop.f32.mrb[60].mxu1  ;;  %v3434_v31 = vpack.c.bf16 %v2046_v27, %v2045_v25  ;;  %v3594_v32 = vpack.c.bf16 %v2110_v28, %v2109_v26 }
 0x17b   : > { %v1371_v33 = vadd.f32 %v4262_v61, %v1370_v29  ;;  %v1627_v34 = vadd.f32 %v4262_v61, %v1626_v30  ;;  %v1372_v35 = vpop.f32.mrb[61].mxu0  ;;  %v1628_v36 = vpop.f32.mrb[61].mxu1 }
 0x17c   : > { %v1373_v37 = vpop.f32.mrb[62].mxu0  ;;  %v1629_v38 = vpop.f32.mrb[62].mxu1  ;;  %3694 = vst [vmem:[%s4280_s23 + $0x70] sm:$0xff] %v3434_v31   ;;  %3726 = vst [vmem:[%s4280_s23 + $0x170] sm:$0xff] %v3594_v32  }
 0x17d   : > { %v1919_v39 = vmul.f32 0.01, %v1371_v33  ;;  %v1983_v40 = vmul.f32 0.01, %v1627_v34  ;;  %v1374_v41 = vadd.f32 %v4262_v61, %v1373_v37  ;;  %v1630_v42 = vadd.f32 %v4262_v61, %v1629_v38  ;;  %v1375_v43 = vpop.f32.mrb[63].mxu0  ;;  %v1631_v44 = vpop.f32.mrb[63].mxu1 }
 0x17e   : > { %vm1791_vm15 = vcmp.ge.f32.partialorder %v1371_v33, 0.0  ;;  %vm1855_vm1 = vcmp.ge.f32.partialorder %v1627_v34, 0.0 }
 0x17f   : > { %vm1792_vm2 = vcmp.ge.f32.partialorder %v1374_v41, 0.0  ;;  %v1920_v45 = vmul.f32 0.01, %v1374_v41  ;;  %vm1856_vm3 = vcmp.ge.f32.partialorder %v1630_v42, 0.0  ;;  %v1984_v46 = vmul.f32 0.01, %v1630_v42 }
 0x180   : > { %v2047_v47 = vsel %vm1791_vm15, %v1371_v33, %v1919_v39  ;;  %v2111_v48 = vsel %vm1855_vm1, %v1627_v34, %v1983_v40 }
 0x181   : > { %v2048_v49 = vsel %vm1792_vm2, %v1374_v41, %v1920_v45  ;;  %v2112_v50 = vsel %vm1856_vm3, %v1630_v42, %v1984_v46 }
 0x182   : > { %v1378_v51 = vpop.f32.mrb[64].mxu0  ;;  %v1634_v52 = vpop.f32.mrb[64].mxu1  ;;  %v3439_v53 = vpack.c.bf16 %v2048_v49, %v2047_v47  ;;  %v3599_v54 = vpack.c.bf16 %v2112_v50, %v2111_v48 }
 0x183   : > { %v1379_v55 = vadd.f32 %v4262_v61, %v1378_v51  ;;  %v1635_v56 = vadd.f32 %v4262_v61, %v1634_v52  ;;  %v1380_v57 = vpop.f32.mrb[65].mxu0  ;;  %v1636_v58 = vpop.f32.mrb[65].mxu1 }
 0x184   : > { %v1381_v59 = vpop.f32.mrb[66].mxu0  ;;  %v1637_v60 = vpop.f32.mrb[66].mxu1  ;;  %3695 = vst [vmem:[%s4280_s23 + $0x78] sm:$0xff] %v3439_v53   ;;  %3727 = vst [vmem:[%s4280_s23 + $0x178] sm:$0xff] %v3599_v54  }
 0x185   : > { %v1921_v62 = vmul.f32 0.01, %v1379_v55  ;;  %v1985_v63 = vmul.f32 0.01, %v1635_v56  ;;  %v1382_v0 = vadd.f32 %v4262_v61, %v1381_v59  ;;  %v1638_v1 = vadd.f32 %v4262_v61, %v1637_v60  ;;  %v1383_v2 = vpop.f32.mrb[67].mxu0  ;;  %v1639_v3 = vpop.f32.mrb[67].mxu1 }
 0x186   : > { %vm1793_vm0 = vcmp.ge.f32.partialorder %v1379_v55, 0.0  ;;  %vm1857_vm4 = vcmp.ge.f32.partialorder %v1635_v56, 0.0  ;;  %v4401_v61 = vld [vmem:[%s4506_s2] ss:$0 sm:$0xff] }
 0x187   : > { %vm1794_vm5 = vcmp.ge.f32.partialorder %v1382_v0, 0.0  ;;  %v1922_v4 = vmul.f32 0.01, %v1382_v0  ;;  %vm1858_vm6 = vcmp.ge.f32.partialorder %v1638_v1, 0.0  ;;  %v1986_v5 = vmul.f32 0.01, %v1638_v1 }
 0x188   : > { %v2049_v6 = vsel %vm1793_vm0, %v1379_v55, %v1921_v62  ;;  %v2113_v7 = vsel %vm1857_vm4, %v1635_v56, %v1985_v63 }
 0x189   : > { %v2050_v8 = vsel %vm1794_vm5, %v1382_v0, %v1922_v4  ;;  %v2114_v9 = vsel %vm1858_vm6, %v1638_v1, %v1986_v5 }
 0x18a   : > { %v1386_v10 = vpop.f32.mrb[68].mxu0  ;;  %v1642_v11 = vpop.f32.mrb[68].mxu1  ;;  %v3444_v12 = vpack.c.bf16 %v2050_v8, %v2049_v6  ;;  %v3604_v13 = vpack.c.bf16 %v2114_v9, %v2113_v7 }
 0x18b   : > { %v1387_v14 = vadd.f32 %v4401_v61, %v1386_v10  ;;  %v1643_v15 = vadd.f32 %v4401_v61, %v1642_v11  ;;  %v1388_v16 = vpop.f32.mrb[69].mxu0  ;;  %v1644_v17 = vpop.f32.mrb[69].mxu1 }
 0x18c   : > { %v1389_v18 = vpop.f32.mrb[70].mxu0  ;;  %v1645_v19 = vpop.f32.mrb[70].mxu1  ;;  %3696 = vst [vmem:[%s4280_s23 + $0x80] sm:$0xff] %v3444_v12   ;;  %3728 = vst [vmem:[%s4280_s23 + $0x180] sm:$0xff] %v3604_v13  }
 0x18d   : > { %v1923_v20 = vmul.f32 0.01, %v1387_v14  ;;  %v1987_v21 = vmul.f32 0.01, %v1643_v15  ;;  %v1390_v22 = vadd.f32 %v4401_v61, %v1389_v18  ;;  %v1646_v23 = vadd.f32 %v4401_v61, %v1645_v19  ;;  %v1391_v24 = vpop.f32.mrb[71].mxu0  ;;  %v1647_v25 = vpop.f32.mrb[71].mxu1 }
 0x18e   : > { %vm1795_vm7 = vcmp.ge.f32.partialorder %v1387_v14, 0.0  ;;  %vm1859_vm8 = vcmp.ge.f32.partialorder %v1643_v15, 0.0 }
 0x18f   : > { %vm1796_vm9 = vcmp.ge.f32.partialorder %v1390_v22, 0.0  ;;  %v1924_v26 = vmul.f32 0.01, %v1390_v22  ;;  %vm1860_vm10 = vcmp.ge.f32.partialorder %v1646_v23, 0.0  ;;  %v1988_v27 = vmul.f32 0.01, %v1646_v23 }
 0x190   : > { %v2051_v28 = vsel %vm1795_vm7, %v1387_v14, %v1923_v20  ;;  %v2115_v29 = vsel %vm1859_vm8, %v1643_v15, %v1987_v21 }
 0x191   : > { %v2052_v30 = vsel %vm1796_vm9, %v1390_v22, %v1924_v26  ;;  %v2116_v31 = vsel %vm1860_vm10, %v1646_v23, %v1988_v27 }
 0x192   : > { %v1394_v32 = vpop.f32.mrb[72].mxu0  ;;  %v1650_v33 = vpop.f32.mrb[72].mxu1  ;;  %v3449_v34 = vpack.c.bf16 %v2052_v30, %v2051_v28  ;;  %v3609_v35 = vpack.c.bf16 %v2116_v31, %v2115_v29 }
 0x193   : > { %v1395_v36 = vadd.f32 %v4401_v61, %v1394_v32  ;;  %v1651_v37 = vadd.f32 %v4401_v61, %v1650_v33  ;;  %v1396_v38 = vpop.f32.mrb[73].mxu0  ;;  %v1652_v39 = vpop.f32.mrb[73].mxu1 }
 0x194   : > { %v1397_v40 = vpop.f32.mrb[74].mxu0  ;;  %v1653_v41 = vpop.f32.mrb[74].mxu1  ;;  %3697 = vst [vmem:[%s4280_s23 + $0x88] sm:$0xff] %v3449_v34   ;;  %3729 = vst [vmem:[%s4280_s23 + $0x188] sm:$0xff] %v3609_v35  }
 0x195   : > { %v1925_v42 = vmul.f32 0.01, %v1395_v36  ;;  %v1989_v43 = vmul.f32 0.01, %v1651_v37  ;;  %v1398_v44 = vadd.f32 %v4401_v61, %v1397_v40  ;;  %v1654_v45 = vadd.f32 %v4401_v61, %v1653_v41  ;;  %v1399_v46 = vpop.f32.mrb[75].mxu0  ;;  %v1655_v47 = vpop.f32.mrb[75].mxu1 }
 0x196   : > { %vm1797_vm11 = vcmp.ge.f32.partialorder %v1395_v36, 0.0  ;;  %vm1861_vm12 = vcmp.ge.f32.partialorder %v1651_v37, 0.0 }
 0x197   : > { %vm1798_vm13 = vcmp.ge.f32.partialorder %v1398_v44, 0.0  ;;  %v1926_v48 = vmul.f32 0.01, %v1398_v44  ;;  %vm1862_vm14 = vcmp.ge.f32.partialorder %v1654_v45, 0.0  ;;  %v1990_v49 = vmul.f32 0.01, %v1654_v45 }
 0x198   : > { %v2053_v50 = vsel %vm1797_vm11, %v1395_v36, %v1925_v42  ;;  %v2117_v51 = vsel %vm1861_vm12, %v1651_v37, %v1989_v43 }
 0x199   : > { %v2054_v52 = vsel %vm1798_vm13, %v1398_v44, %v1926_v48  ;;  %v2118_v53 = vsel %vm1862_vm14, %v1654_v45, %v1990_v49 }
 0x19a   : > { %v1402_v54 = vpop.f32.mrb[76].mxu0  ;;  %v1658_v55 = vpop.f32.mrb[76].mxu1  ;;  %v3454_v56 = vpack.c.bf16 %v2054_v52, %v2053_v50  ;;  %v3614_v57 = vpack.c.bf16 %v2118_v53, %v2117_v51 }
 0x19b   : > { %v1403_v58 = vadd.f32 %v4401_v61, %v1402_v54  ;;  %v1659_v59 = vadd.f32 %v4401_v61, %v1658_v55  ;;  %v1404_v60 = vpop.f32.mrb[77].mxu0  ;;  %v1660_v62 = vpop.f32.mrb[77].mxu1 }
 0x19c   : > { %v1405_v63 = vpop.f32.mrb[78].mxu0  ;;  %v1661_v0 = vpop.f32.mrb[78].mxu1  ;;  %3698 = vst [vmem:[%s4280_s23 + $0x90] sm:$0xff] %v3454_v56   ;;  %3730 = vst [vmem:[%s4280_s23 + $0x190] sm:$0xff] %v3614_v57  }
 0x19d   : > { %v1927_v1 = vmul.f32 0.01, %v1403_v58  ;;  %v1991_v2 = vmul.f32 0.01, %v1659_v59  ;;  %v1406_v3 = vadd.f32 %v4401_v61, %v1405_v63  ;;  %v1662_v4 = vadd.f32 %v4401_v61, %v1661_v0  ;;  %v1407_v5 = vpop.f32.mrb[79].mxu0  ;;  %v1663_v6 = vpop.f32.mrb[79].mxu1 }
 0x19e   : > { %vm1799_vm15 = vcmp.ge.f32.partialorder %v1403_v58, 0.0  ;;  %vm1863_vm1 = vcmp.ge.f32.partialorder %v1659_v59, 0.0 }
 0x19f   : > { %vm1800_vm2 = vcmp.ge.f32.partialorder %v1406_v3, 0.0  ;;  %v1928_v7 = vmul.f32 0.01, %v1406_v3  ;;  %vm1864_vm3 = vcmp.ge.f32.partialorder %v1662_v4, 0.0  ;;  %v1992_v8 = vmul.f32 0.01, %v1662_v4 }
 0x1a0   : > { %v2055_v9 = vsel %vm1799_vm15, %v1403_v58, %v1927_v1  ;;  %v2119_v10 = vsel %vm1863_vm1, %v1659_v59, %v1991_v2 }
 0x1a1   : > { %v2056_v11 = vsel %vm1800_vm2, %v1406_v3, %v1928_v7  ;;  %v2120_v12 = vsel %vm1864_vm3, %v1662_v4, %v1992_v8 }
 0x1a2   : > { %v1410_v13 = vpop.f32.mrb[80].mxu0  ;;  %v1666_v14 = vpop.f32.mrb[80].mxu1  ;;  %v3459_v15 = vpack.c.bf16 %v2056_v11, %v2055_v9  ;;  %v3619_v16 = vpack.c.bf16 %v2120_v12, %v2119_v10 }
 0x1a3   : > { %v1411_v17 = vadd.f32 %v4401_v61, %v1410_v13  ;;  %v1667_v18 = vadd.f32 %v4401_v61, %v1666_v14  ;;  %v1412_v19 = vpop.f32.mrb[81].mxu0  ;;  %v1668_v20 = vpop.f32.mrb[81].mxu1 }
 0x1a4   : > { %v1413_v21 = vpop.f32.mrb[82].mxu0  ;;  %v1669_v22 = vpop.f32.mrb[82].mxu1  ;;  %3699 = vst [vmem:[%s4280_s23 + $0x98] sm:$0xff] %v3459_v15   ;;  %3731 = vst [vmem:[%s4280_s23 + $0x198] sm:$0xff] %v3619_v16  }
 0x1a5   : > { %v1929_v23 = vmul.f32 0.01, %v1411_v17  ;;  %v1993_v24 = vmul.f32 0.01, %v1667_v18  ;;  %v1414_v25 = vadd.f32 %v4401_v61, %v1413_v21  ;;  %v1670_v26 = vadd.f32 %v4401_v61, %v1669_v22  ;;  %v1415_v27 = vpop.f32.mrb[83].mxu0  ;;  %v1671_v28 = vpop.f32.mrb[83].mxu1 }
 0x1a6   : > { %vm1801_vm0 = vcmp.ge.f32.partialorder %v1411_v17, 0.0  ;;  %vm1865_vm4 = vcmp.ge.f32.partialorder %v1667_v18, 0.0 }
 0x1a7   : > { %vm1802_vm5 = vcmp.ge.f32.partialorder %v1414_v25, 0.0  ;;  %v1930_v29 = vmul.f32 0.01, %v1414_v25  ;;  %vm1866_vm6 = vcmp.ge.f32.partialorder %v1670_v26, 0.0  ;;  %v1994_v30 = vmul.f32 0.01, %v1670_v26 }
 0x1a8   : > { %v2057_v31 = vsel %vm1801_vm0, %v1411_v17, %v1929_v23  ;;  %v2121_v32 = vsel %vm1865_vm4, %v1667_v18, %v1993_v24 }
 0x1a9   : > { %v2058_v33 = vsel %vm1802_vm5, %v1414_v25, %v1930_v29  ;;  %v2122_v34 = vsel %vm1866_vm6, %v1670_v26, %v1994_v30 }
 0x1aa   : > { %v1418_v35 = vpop.f32.mrb[84].mxu0  ;;  %v1674_v36 = vpop.f32.mrb[84].mxu1  ;;  %v3464_v37 = vpack.c.bf16 %v2058_v33, %v2057_v31  ;;  %v3624_v38 = vpack.c.bf16 %v2122_v34, %v2121_v32 }
 0x1ab   : > { %v1419_v39 = vadd.f32 %v4401_v61, %v1418_v35  ;;  %v1675_v40 = vadd.f32 %v4401_v61, %v1674_v36  ;;  %v1420_v41 = vpop.f32.mrb[85].mxu0  ;;  %v1676_v42 = vpop.f32.mrb[85].mxu1 }
 0x1ac   : > { %v1421_v43 = vpop.f32.mrb[86].mxu0  ;;  %v1677_v44 = vpop.f32.mrb[86].mxu1  ;;  %3700 = vst [vmem:[%s4280_s23 + $0xa0] sm:$0xff] %v3464_v37   ;;  %3732 = vst [vmem:[%s4280_s23 + $0x1a0] sm:$0xff] %v3624_v38  }
 0x1ad   : > { %v1931_v45 = vmul.f32 0.01, %v1419_v39  ;;  %v1995_v46 = vmul.f32 0.01, %v1675_v40  ;;  %v1422_v47 = vadd.f32 %v4401_v61, %v1421_v43  ;;  %v1678_v48 = vadd.f32 %v4401_v61, %v1677_v44  ;;  %v1423_v49 = vpop.f32.mrb[87].mxu0  ;;  %v1679_v50 = vpop.f32.mrb[87].mxu1 }
 0x1ae   : > { %vm1803_vm7 = vcmp.ge.f32.partialorder %v1419_v39, 0.0  ;;  %vm1867_vm8 = vcmp.ge.f32.partialorder %v1675_v40, 0.0 }
 0x1af   : > { %vm1804_vm9 = vcmp.ge.f32.partialorder %v1422_v47, 0.0  ;;  %v1932_v51 = vmul.f32 0.01, %v1422_v47  ;;  %vm1868_vm10 = vcmp.ge.f32.partialorder %v1678_v48, 0.0  ;;  %v1996_v52 = vmul.f32 0.01, %v1678_v48 }
 0x1b0   : > { %v2059_v53 = vsel %vm1803_vm7, %v1419_v39, %v1931_v45  ;;  %v2123_v54 = vsel %vm1867_vm8, %v1675_v40, %v1995_v46 }
 0x1b1   : > { %v2060_v55 = vsel %vm1804_vm9, %v1422_v47, %v1932_v51  ;;  %v2124_v56 = vsel %vm1868_vm10, %v1678_v48, %v1996_v52 }
 0x1b2   : > { %v1426_v57 = vpop.f32.mrb[88].mxu0  ;;  %v1682_v58 = vpop.f32.mrb[88].mxu1  ;;  %v3469_v59 = vpack.c.bf16 %v2060_v55, %v2059_v53  ;;  %v3629_v60 = vpack.c.bf16 %v2124_v56, %v2123_v54 }
 0x1b3   : > { %v1427_v62 = vadd.f32 %v4401_v61, %v1426_v57  ;;  %v1683_v63 = vadd.f32 %v4401_v61, %v1682_v58  ;;  %v1428_v0 = vpop.f32.mrb[89].mxu0  ;;  %v1684_v1 = vpop.f32.mrb[89].mxu1 }
 0x1b4   : > { %v1429_v2 = vpop.f32.mrb[90].mxu0  ;;  %v1685_v3 = vpop.f32.mrb[90].mxu1  ;;  %3701 = vst [vmem:[%s4280_s23 + $0xa8] sm:$0xff] %v3469_v59   ;;  %3733 = vst [vmem:[%s4280_s23 + $0x1a8] sm:$0xff] %v3629_v60  }
 0x1b5   : > { %v1933_v4 = vmul.f32 0.01, %v1427_v62  ;;  %v1997_v5 = vmul.f32 0.01, %v1683_v63  ;;  %v1430_v6 = vadd.f32 %v4401_v61, %v1429_v2  ;;  %v1686_v7 = vadd.f32 %v4401_v61, %v1685_v3  ;;  %v1431_v8 = vpop.f32.mrb[91].mxu0  ;;  %v1687_v9 = vpop.f32.mrb[91].mxu1 }
 0x1b6   : > { %vm1805_vm11 = vcmp.ge.f32.partialorder %v1427_v62, 0.0  ;;  %vm1869_vm12 = vcmp.ge.f32.partialorder %v1683_v63, 0.0 }
 0x1b7   : > { %vm1806_vm13 = vcmp.ge.f32.partialorder %v1430_v6, 0.0  ;;  %v1934_v10 = vmul.f32 0.01, %v1430_v6  ;;  %vm1870_vm14 = vcmp.ge.f32.partialorder %v1686_v7, 0.0  ;;  %v1998_v11 = vmul.f32 0.01, %v1686_v7 }
 0x1b8   : > { %v2061_v12 = vsel %vm1805_vm11, %v1427_v62, %v1933_v4  ;;  %v2125_v13 = vsel %vm1869_vm12, %v1683_v63, %v1997_v5 }
 0x1b9   : > { %v2062_v14 = vsel %vm1806_vm13, %v1430_v6, %v1934_v10  ;;  %v2126_v15 = vsel %vm1870_vm14, %v1686_v7, %v1998_v11 }
 0x1ba   : > { %v1434_v16 = vpop.f32.mrb[92].mxu0  ;;  %v1690_v17 = vpop.f32.mrb[92].mxu1  ;;  %v3474_v18 = vpack.c.bf16 %v2062_v14, %v2061_v12  ;;  %v3634_v19 = vpack.c.bf16 %v2126_v15, %v2125_v13 }
 0x1bb   : > { %v1435_v20 = vadd.f32 %v4401_v61, %v1434_v16  ;;  %v1691_v21 = vadd.f32 %v4401_v61, %v1690_v17  ;;  %v1436_v22 = vpop.f32.mrb[93].mxu0  ;;  %v1692_v23 = vpop.f32.mrb[93].mxu1 }
 0x1bc   : > { %v1437_v24 = vpop.f32.mrb[94].mxu0  ;;  %v1693_v25 = vpop.f32.mrb[94].mxu1  ;;  %3702 = vst [vmem:[%s4280_s23 + $0xb0] sm:$0xff] %v3474_v18   ;;  %3734 = vst [vmem:[%s4280_s23 + $0x1b0] sm:$0xff] %v3634_v19  }
 0x1bd   : > { %v1935_v26 = vmul.f32 0.01, %v1435_v20  ;;  %v1999_v27 = vmul.f32 0.01, %v1691_v21  ;;  %v1438_v28 = vadd.f32 %v4401_v61, %v1437_v24  ;;  %v1694_v29 = vadd.f32 %v4401_v61, %v1693_v25  ;;  %v1439_v30 = vpop.f32.mrb[95].mxu0  ;;  %v1695_v31 = vpop.f32.mrb[95].mxu1 }
 0x1be   : > { %vm1807_vm15 = vcmp.ge.f32.partialorder %v1435_v20, 0.0  ;;  %vm1871_vm1 = vcmp.ge.f32.partialorder %v1691_v21, 0.0 }
 0x1bf   : > { %vm1808_vm2 = vcmp.ge.f32.partialorder %v1438_v28, 0.0  ;;  %v1936_v32 = vmul.f32 0.01, %v1438_v28  ;;  %vm1872_vm3 = vcmp.ge.f32.partialorder %v1694_v29, 0.0  ;;  %v2000_v33 = vmul.f32 0.01, %v1694_v29 }
 0x1c0   : > { %v2063_v34 = vsel %vm1807_vm15, %v1435_v20, %v1935_v26  ;;  %v2127_v35 = vsel %vm1871_vm1, %v1691_v21, %v1999_v27 }
 0x1c1   : > { %v2064_v36 = vsel %vm1808_vm2, %v1438_v28, %v1936_v32  ;;  %v2128_v37 = vsel %vm1872_vm3, %v1694_v29, %v2000_v33 }
 0x1c2   : > { %v1442_v38 = vpop.f32.mrb[96].mxu0  ;;  %v1698_v39 = vpop.f32.mrb[96].mxu1  ;;  %v3479_v40 = vpack.c.bf16 %v2064_v36, %v2063_v34  ;;  %v3639_v41 = vpack.c.bf16 %v2128_v37, %v2127_v35 }
 0x1c3   : > { %v1443_v42 = vadd.f32 %v4401_v61, %v1442_v38  ;;  %v1699_v43 = vadd.f32 %v4401_v61, %v1698_v39  ;;  %v1444_v44 = vpop.f32.mrb[97].mxu0  ;;  %v1700_v45 = vpop.f32.mrb[97].mxu1 }
 0x1c4   : > { %v1445_v46 = vpop.f32.mrb[98].mxu0  ;;  %v1701_v47 = vpop.f32.mrb[98].mxu1  ;;  %3703 = vst [vmem:[%s4280_s23 + $0xb8] sm:$0xff] %v3479_v40   ;;  %3735 = vst [vmem:[%s4280_s23 + $0x1b8] sm:$0xff] %v3639_v41  }
 0x1c5   : > { %v1937_v48 = vmul.f32 0.01, %v1443_v42  ;;  %v2001_v49 = vmul.f32 0.01, %v1699_v43  ;;  %v1446_v50 = vadd.f32 %v4401_v61, %v1445_v46  ;;  %v1702_v51 = vadd.f32 %v4401_v61, %v1701_v47  ;;  %v1447_v52 = vpop.f32.mrb[99].mxu0  ;;  %v1703_v53 = vpop.f32.mrb[99].mxu1 }
 0x1c6   : > { %vm1809_vm0 = vcmp.ge.f32.partialorder %v1443_v42, 0.0  ;;  %vm1873_vm4 = vcmp.ge.f32.partialorder %v1699_v43, 0.0 }
 0x1c7   : > { %vm1810_vm5 = vcmp.ge.f32.partialorder %v1446_v50, 0.0  ;;  %v1938_v54 = vmul.f32 0.01, %v1446_v50  ;;  %vm1874_vm6 = vcmp.ge.f32.partialorder %v1702_v51, 0.0  ;;  %v2002_v55 = vmul.f32 0.01, %v1702_v51 }
 0x1c8   : > { %v2065_v56 = vsel %vm1809_vm0, %v1443_v42, %v1937_v48  ;;  %v2129_v57 = vsel %vm1873_vm4, %v1699_v43, %v2001_v49 }
 0x1c9   : > { %v2066_v58 = vsel %vm1810_vm5, %v1446_v50, %v1938_v54  ;;  %v2130_v59 = vsel %vm1874_vm6, %v1702_v51, %v2002_v55 }
 0x1ca   : > { %v1450_v60 = vpop.f32.mrb[100].mxu0  ;;  %v1706_v62 = vpop.f32.mrb[100].mxu1  ;;  %v3484_v63 = vpack.c.bf16 %v2066_v58, %v2065_v56  ;;  %v3644_v0 = vpack.c.bf16 %v2130_v59, %v2129_v57 }
 0x1cb   : > { %v1451_v1 = vadd.f32 %v4401_v61, %v1450_v60  ;;  %v1707_v2 = vadd.f32 %v4401_v61, %v1706_v62  ;;  %v1452_v3 = vpop.f32.mrb[101].mxu0  ;;  %v1708_v4 = vpop.f32.mrb[101].mxu1 }
 0x1cc   : > { %v1453_v5 = vpop.f32.mrb[102].mxu0  ;;  %v1709_v6 = vpop.f32.mrb[102].mxu1  ;;  %3704 = vst [vmem:[%s4280_s23 + $0xc0] sm:$0xff] %v3484_v63   ;;  %3736 = vst [vmem:[%s4280_s23 + $0x1c0] sm:$0xff] %v3644_v0  }
 0x1cd   : > { %v1939_v7 = vmul.f32 0.01, %v1451_v1  ;;  %v2003_v8 = vmul.f32 0.01, %v1707_v2  ;;  %v1454_v9 = vadd.f32 %v4401_v61, %v1453_v5  ;;  %v1710_v10 = vadd.f32 %v4401_v61, %v1709_v6  ;;  %v1455_v11 = vpop.f32.mrb[103].mxu0  ;;  %v1711_v12 = vpop.f32.mrb[103].mxu1 }
 0x1ce   : > { %vm1811_vm7 = vcmp.ge.f32.partialorder %v1451_v1, 0.0  ;;  %vm1875_vm8 = vcmp.ge.f32.partialorder %v1707_v2, 0.0 }
 0x1cf   : > { %vm1812_vm9 = vcmp.ge.f32.partialorder %v1454_v9, 0.0  ;;  %v1940_v13 = vmul.f32 0.01, %v1454_v9  ;;  %vm1876_vm10 = vcmp.ge.f32.partialorder %v1710_v10, 0.0  ;;  %v2004_v14 = vmul.f32 0.01, %v1710_v10 }
 0x1d0   : > { %v2067_v15 = vsel %vm1811_vm7, %v1451_v1, %v1939_v7  ;;  %v2131_v16 = vsel %vm1875_vm8, %v1707_v2, %v2003_v8 }
 0x1d1   : > { %v2068_v17 = vsel %vm1812_vm9, %v1454_v9, %v1940_v13  ;;  %v2132_v18 = vsel %vm1876_vm10, %v1710_v10, %v2004_v14 }
 0x1d2   : > { %v1458_v19 = vpop.f32.mrb[104].mxu0  ;;  %v1714_v20 = vpop.f32.mrb[104].mxu1  ;;  %v3489_v21 = vpack.c.bf16 %v2068_v17, %v2067_v15  ;;  %v3649_v22 = vpack.c.bf16 %v2132_v18, %v2131_v16 }
 0x1d3   : > { %v1459_v23 = vadd.f32 %v4401_v61, %v1458_v19  ;;  %v1715_v24 = vadd.f32 %v4401_v61, %v1714_v20  ;;  %v1460_v25 = vpop.f32.mrb[105].mxu0  ;;  %v1716_v26 = vpop.f32.mrb[105].mxu1 }
 0x1d4   : > { %v1461_v27 = vpop.f32.mrb[106].mxu0  ;;  %v1717_v28 = vpop.f32.mrb[106].mxu1  ;;  %3705 = vst [vmem:[%s4280_s23 + $0xc8] sm:$0xff] %v3489_v21   ;;  %3737 = vst [vmem:[%s4280_s23 + $0x1c8] sm:$0xff] %v3649_v22  }
 0x1d5   : > { %v1941_v29 = vmul.f32 0.01, %v1459_v23  ;;  %v2005_v30 = vmul.f32 0.01, %v1715_v24  ;;  %v1462_v31 = vadd.f32 %v4401_v61, %v1461_v27  ;;  %v1718_v32 = vadd.f32 %v4401_v61, %v1717_v28  ;;  %v1463_v33 = vpop.f32.mrb[107].mxu0  ;;  %v1719_v34 = vpop.f32.mrb[107].mxu1 }
 0x1d6   : > { %vm1813_vm11 = vcmp.ge.f32.partialorder %v1459_v23, 0.0  ;;  %vm1877_vm12 = vcmp.ge.f32.partialorder %v1715_v24, 0.0 }
 0x1d7   : > { %vm1814_vm13 = vcmp.ge.f32.partialorder %v1462_v31, 0.0  ;;  %v1942_v35 = vmul.f32 0.01, %v1462_v31  ;;  %vm1878_vm14 = vcmp.ge.f32.partialorder %v1718_v32, 0.0  ;;  %v2006_v36 = vmul.f32 0.01, %v1718_v32 }
 0x1d8   : > { %v2069_v37 = vsel %vm1813_vm11, %v1459_v23, %v1941_v29  ;;  %v2133_v38 = vsel %vm1877_vm12, %v1715_v24, %v2005_v30 }
 0x1d9   : > { %v2070_v39 = vsel %vm1814_vm13, %v1462_v31, %v1942_v35  ;;  %v2134_v40 = vsel %vm1878_vm14, %v1718_v32, %v2006_v36 }
 0x1da   : > { %v1466_v41 = vpop.f32.mrb[108].mxu0  ;;  %v1722_v42 = vpop.f32.mrb[108].mxu1  ;;  %v3494_v43 = vpack.c.bf16 %v2070_v39, %v2069_v37  ;;  %v3654_v44 = vpack.c.bf16 %v2134_v40, %v2133_v38 }
 0x1db   : > { %v1467_v45 = vadd.f32 %v4401_v61, %v1466_v41  ;;  %v1723_v46 = vadd.f32 %v4401_v61, %v1722_v42  ;;  %v1468_v47 = vpop.f32.mrb[109].mxu0  ;;  %v1724_v48 = vpop.f32.mrb[109].mxu1 }
 0x1dc   : > { %v1469_v49 = vpop.f32.mrb[110].mxu0  ;;  %v1725_v50 = vpop.f32.mrb[110].mxu1  ;;  %3706 = vst [vmem:[%s4280_s23 + $0xd0] sm:$0xff] %v3494_v43   ;;  %3738 = vst [vmem:[%s4280_s23 + $0x1d0] sm:$0xff] %v3654_v44  }
 0x1dd   : > { %v1943_v51 = vmul.f32 0.01, %v1467_v45  ;;  %v2007_v52 = vmul.f32 0.01, %v1723_v46  ;;  %v1470_v53 = vadd.f32 %v4401_v61, %v1469_v49  ;;  %v1726_v54 = vadd.f32 %v4401_v61, %v1725_v50  ;;  %v1471_v55 = vpop.f32.mrb[111].mxu0  ;;  %v1727_v56 = vpop.f32.mrb[111].mxu1 }
 0x1de   : > { %vm1815_vm15 = vcmp.ge.f32.partialorder %v1467_v45, 0.0  ;;  %vm1879_vm1 = vcmp.ge.f32.partialorder %v1723_v46, 0.0 }
 0x1df   : > { %vm1816_vm2 = vcmp.ge.f32.partialorder %v1470_v53, 0.0  ;;  %v1944_v57 = vmul.f32 0.01, %v1470_v53  ;;  %vm1880_vm3 = vcmp.ge.f32.partialorder %v1726_v54, 0.0  ;;  %v2008_v58 = vmul.f32 0.01, %v1726_v54 }
 0x1e0   : > { %v2071_v59 = vsel %vm1815_vm15, %v1467_v45, %v1943_v51  ;;  %v2135_v60 = vsel %vm1879_vm1, %v1723_v46, %v2007_v52 }
 0x1e1   : > { %v2072_v62 = vsel %vm1816_vm2, %v1470_v53, %v1944_v57  ;;  %v2136_v63 = vsel %vm1880_vm3, %v1726_v54, %v2008_v58 }
 0x1e2   : > { %v1474_v0 = vpop.f32.mrb[112].mxu0  ;;  %v1730_v1 = vpop.f32.mrb[112].mxu1  ;;  %v3499_v2 = vpack.c.bf16 %v2072_v62, %v2071_v59  ;;  %v3659_v3 = vpack.c.bf16 %v2136_v63, %v2135_v60 }
 0x1e3   : > { %v1475_v4 = vadd.f32 %v4401_v61, %v1474_v0  ;;  %v1731_v5 = vadd.f32 %v4401_v61, %v1730_v1  ;;  %v1476_v6 = vpop.f32.mrb[113].mxu0  ;;  %v1732_v7 = vpop.f32.mrb[113].mxu1 }
 0x1e4   : > { %v1477_v8 = vpop.f32.mrb[114].mxu0  ;;  %v1733_v9 = vpop.f32.mrb[114].mxu1  ;;  %3707 = vst [vmem:[%s4280_s23 + $0xd8] sm:$0xff] %v3499_v2   ;;  %3739 = vst [vmem:[%s4280_s23 + $0x1d8] sm:$0xff] %v3659_v3  }
 0x1e5   : > { %v1945_v10 = vmul.f32 0.01, %v1475_v4  ;;  %v2009_v11 = vmul.f32 0.01, %v1731_v5  ;;  %v1478_v12 = vadd.f32 %v4401_v61, %v1477_v8  ;;  %v1734_v13 = vadd.f32 %v4401_v61, %v1733_v9  ;;  %v1479_v14 = vpop.f32.mrb[115].mxu0  ;;  %v1735_v15 = vpop.f32.mrb[115].mxu1 }
 0x1e6   : > { %vm1817_vm0 = vcmp.ge.f32.partialorder %v1475_v4, 0.0  ;;  %vm1881_vm4 = vcmp.ge.f32.partialorder %v1731_v5, 0.0 }
 0x1e7   : > { %vm1818_vm5 = vcmp.ge.f32.partialorder %v1478_v12, 0.0  ;;  %v1946_v16 = vmul.f32 0.01, %v1478_v12  ;;  %vm1882_vm6 = vcmp.ge.f32.partialorder %v1734_v13, 0.0  ;;  %v2010_v17 = vmul.f32 0.01, %v1734_v13 }
 0x1e8   : > { %v2073_v18 = vsel %vm1817_vm0, %v1475_v4, %v1945_v10  ;;  %v2137_v19 = vsel %vm1881_vm4, %v1731_v5, %v2009_v11 }
 0x1e9   : > { %v2074_v20 = vsel %vm1818_vm5, %v1478_v12, %v1946_v16  ;;  %v2138_v21 = vsel %vm1882_vm6, %v1734_v13, %v2010_v17 }
 0x1ea   : > { %v1482_v22 = vpop.f32.mrb[116].mxu0  ;;  %v1738_v23 = vpop.f32.mrb[116].mxu1  ;;  %v3504_v24 = vpack.c.bf16 %v2074_v20, %v2073_v18  ;;  %v3664_v25 = vpack.c.bf16 %v2138_v21, %v2137_v19 }
 0x1eb   : > { %v1483_v26 = vadd.f32 %v4401_v61, %v1482_v22  ;;  %v1739_v27 = vadd.f32 %v4401_v61, %v1738_v23  ;;  %v1484_v28 = vpop.f32.mrb[117].mxu0  ;;  %v1740_v29 = vpop.f32.mrb[117].mxu1 }
 0x1ec   : > { %v1485_v30 = vpop.f32.mrb[118].mxu0  ;;  %v1741_v31 = vpop.f32.mrb[118].mxu1  ;;  %3708 = vst [vmem:[%s4280_s23 + $0xe0] sm:$0xff] %v3504_v24   ;;  %3740 = vst [vmem:[%s4280_s23 + $0x1e0] sm:$0xff] %v3664_v25  }
 0x1ed   : > { %v1947_v32 = vmul.f32 0.01, %v1483_v26  ;;  %v2011_v33 = vmul.f32 0.01, %v1739_v27  ;;  %v1486_v34 = vadd.f32 %v4401_v61, %v1485_v30  ;;  %v1742_v35 = vadd.f32 %v4401_v61, %v1741_v31  ;;  %v1487_v36 = vpop.f32.mrb[119].mxu0  ;;  %v1743_v37 = vpop.f32.mrb[119].mxu1 }
 0x1ee   : > { %vm1819_vm7 = vcmp.ge.f32.partialorder %v1483_v26, 0.0  ;;  %vm1883_vm8 = vcmp.ge.f32.partialorder %v1739_v27, 0.0 }
 0x1ef   : > { %vm1820_vm9 = vcmp.ge.f32.partialorder %v1486_v34, 0.0  ;;  %v1948_v38 = vmul.f32 0.01, %v1486_v34  ;;  %vm1884_vm10 = vcmp.ge.f32.partialorder %v1742_v35, 0.0  ;;  %v2012_v39 = vmul.f32 0.01, %v1742_v35 }
 0x1f0   : > { %v2075_v40 = vsel %vm1819_vm7, %v1483_v26, %v1947_v32  ;;  %v2139_v41 = vsel %vm1883_vm8, %v1739_v27, %v2011_v33 }
 0x1f1   : > { %v2076_v42 = vsel %vm1820_vm9, %v1486_v34, %v1948_v38  ;;  %v2140_v43 = vsel %vm1884_vm10, %v1742_v35, %v2012_v39 }
 0x1f2   : > { %v1490_v44 = vpop.f32.mrb[120].mxu0  ;;  %v1746_v45 = vpop.f32.mrb[120].mxu1  ;;  %v3509_v46 = vpack.c.bf16 %v2076_v42, %v2075_v40  ;;  %v3669_v47 = vpack.c.bf16 %v2140_v43, %v2139_v41 }
 0x1f3   : > { %v1491_v48 = vadd.f32 %v4401_v61, %v1490_v44  ;;  %v1747_v49 = vadd.f32 %v4401_v61, %v1746_v45  ;;  %v1492_v50 = vpop.f32.mrb[121].mxu0  ;;  %v1748_v51 = vpop.f32.mrb[121].mxu1 }
 0x1f4   : > { %v1493_v52 = vpop.f32.mrb[122].mxu0  ;;  %v1749_v53 = vpop.f32.mrb[122].mxu1  ;;  %3709 = vst [vmem:[%s4280_s23 + $0xe8] sm:$0xff] %v3509_v46   ;;  %3741 = vst [vmem:[%s4280_s23 + $0x1e8] sm:$0xff] %v3669_v47  }
 0x1f5   : > { %v1949_v54 = vmul.f32 0.01, %v1491_v48  ;;  %v2013_v55 = vmul.f32 0.01, %v1747_v49  ;;  %v1494_v56 = vadd.f32 %v4401_v61, %v1493_v52  ;;  %v1750_v57 = vadd.f32 %v4401_v61, %v1749_v53  ;;  %v1495_v58 = vpop.f32.mrb[123].mxu0  ;;  %v1751_v59 = vpop.f32.mrb[123].mxu1 }
 0x1f6   : > { %vm1821_vm11 = vcmp.ge.f32.partialorder %v1491_v48, 0.0  ;;  %vm1885_vm12 = vcmp.ge.f32.partialorder %v1747_v49, 0.0 }
 0x1f7   : > { %vm1822_vm13 = vcmp.ge.f32.partialorder %v1494_v56, 0.0  ;;  %v1950_v60 = vmul.f32 0.01, %v1494_v56  ;;  %vm1886_vm14 = vcmp.ge.f32.partialorder %v1750_v57, 0.0  ;;  %v2014_v62 = vmul.f32 0.01, %v1750_v57 }
 0x1f8   : > { %v2077_v63 = vsel %vm1821_vm11, %v1491_v48, %v1949_v54  ;;  %v2141_v0 = vsel %vm1885_vm12, %v1747_v49, %v2013_v55 }
 0x1f9   : > { %v2078_v1 = vsel %vm1822_vm13, %v1494_v56, %v1950_v60  ;;  %v2142_v2 = vsel %vm1886_vm14, %v1750_v57, %v2014_v62 }
 0x1fa   : > { %v1498_v3 = vpop.f32.mrb[124].mxu0  ;;  %v1754_v4 = vpop.f32.mrb[124].mxu1  ;;  %v3514_v5 = vpack.c.bf16 %v2078_v1, %v2077_v63  ;;  %v3674_v6 = vpack.c.bf16 %v2142_v2, %v2141_v0 }
 0x1fb   : > { %v1499_v7 = vadd.f32 %v4401_v61, %v1498_v3  ;;  %v1755_v8 = vadd.f32 %v4401_v61, %v1754_v4  ;;  %v1500_v9 = vpop.f32.mrb[125].mxu0  ;;  %v1756_v10 = vpop.f32.mrb[125].mxu1 }
 0x1fc   : > { %v1501_v11 = vpop.f32.mrb[126].mxu0  ;;  %v1757_v12 = vpop.f32.mrb[126].mxu1  ;;  %3710 = vst [vmem:[%s4280_s23 + $0xf0] sm:$0xff] %v3514_v5   ;;  %3742 = vst [vmem:[%s4280_s23 + $0x1f0] sm:$0xff] %v3674_v6  }
 0x1fd   : > { %v1951_v13 = vmul.f32 0.01, %v1499_v7  ;;  %v2015_v14 = vmul.f32 0.01, %v1755_v8  ;;  %v1502_v15 = vadd.f32 %v4401_v61, %v1501_v11  ;;  %v1758_v16 = vadd.f32 %v4401_v61, %v1757_v12  ;;  %v1503_v17 = vpop.f32.mrb[127].mxu0  ;;  %v1759_v18 = vpop.f32.mrb[127].mxu1 }
 0x1fe   : > { %vm1823_vm15 = vcmp.ge.f32.partialorder %v1499_v7, 0.0  ;;  %vm1887_vm1 = vcmp.ge.f32.partialorder %v1755_v8, 0.0 }
 0x1ff   : > { %vm1824_vm2 = vcmp.ge.f32.partialorder %v1502_v15, 0.0  ;;  %v1952_v19 = vmul.f32 0.01, %v1502_v15  ;;  %vm1888_vm3 = vcmp.ge.f32.partialorder %v1758_v16, 0.0  ;;  %v2016_v20 = vmul.f32 0.01, %v1758_v16 }
 0x200   : > { %v2079_v21 = vsel %vm1823_vm15, %v1499_v7, %v1951_v13  ;;  %v2143_v22 = vsel %vm1887_vm1, %v1755_v8, %v2015_v14 }
 0x201   : > { %v2080_v23 = vsel %vm1824_vm2, %v1502_v15, %v1952_v19  ;;  %v2144_v24 = vsel %vm1888_vm3, %v1758_v16, %v2016_v20 }
 0x202   : > { %v3519_v25 = vpack.c.bf16 %v2080_v23, %v2079_v21  ;;  %v3679_v26 = vpack.c.bf16 %v2144_v24, %v2143_v22 }
 0x204   : > { %3711 = vst [vmem:[%s4280_s23 + $0xf8] sm:$0xff] %v3519_v25   ;;  %3743 = vst [vmem:[%s4280_s23 + $0x1f8] sm:$0xff] %v3679_v26  }
 0x205 PF: > { %s13_s14 = sadd.s32 1, %s4015_s14   ;;  %s4508_s12 = smov %s4011_s13 }
 0x206   : > { %p10_p5 = scmp.ge.s32.totalorder %s13_s14, 4   ;;  %s4509_s13 = smov %s4511_s15 }
 0x208   :  { %12 = sbr.rel (!%p10_p5) target bundleno = 2 (0x2), region = 68 }

</bundles_post_ra>
